<compile_context>
chip_gen: v5e
topology: v5e:2x2
jax: 0.10.0
libtpu: 0.0.40
codegen_flags: <defaults>
</compile_context>

<pallas_src>
import jax
import jax.numpy as jnp
from jax import lax
from jax.experimental import pallas as pl
from jax.experimental.pallas import tpu as pltpu


_SENTINEL = jnp.iinfo(jnp.int32).min  # label used for padded batch rows


def _lane_group_sum(x, tn):
    """(tm, tn) -> (tm, 128) partial sums over static 128-lane groups (VPU only)."""
    acc = x[:, 0:128]
    for g in range(1, tn // 128):
        acc = acc + x[:, g * 128:(g + 1) * 128]
    return acc


def _pick_row_tile(b_pad: int, max_tm: int) -> int:
    # Largest MXU-friendly row tile that divides the padded batch, keeps at
    # least two row blocks (so v7x can shard the "parallel" axis across both
    # TensorCores) and keeps the distance strip inside the VMEM budget.
    for t in (512, 256, 128, 64, 32, 16, 8):
        if t <= max_tm and b_pad % t == 0 and b_pad // t >= 2:
            return t
    return 8


def _make_kernel(tm: int, tn: int, margin: float, has_pad: bool, precision):
    def kernel(xr_ref, xcols_ref, labr_ref, labc_ref, sqr_ref, sqc_ref,
               out_ref, pos_acc, hinge_acc, pos_row, strip):
        i = pl.program_id(0)     # row block
        p = pl.program_id(1)     # pass: 0 = distances/positives, 1 = hinge
        j = pl.program_id(2)     # column block
        last_j = pl.num_programs(2) - 1

        @pl.when(jnp.logical_and(p == 0, j == 0))
        def _init():
            pos_acc[...] = jnp.zeros_like(pos_acc)
            hinge_acc[...] = jnp.zeros_like(hinge_acc)

        @pl.when(p == 0)
        def _pass0():
            # Gram tile from the VMEM-resident column slab (contract feature
            # axes directly -> no explicit transpose).
            gram = lax.dot_general(
                xr_ref[...], xcols_ref[j],
                dimension_numbers=(((1,), (1,)), ((), ())),
                precision=precision,
                preferred_element_type=jnp.float32)            # (tm, tn)
            labc = labc_ref[j]                                 # (1, tn)
            d2 = sqr_ref[...] + sqc_ref[j] - 2.0 * gram
            d = jnp.sqrt(jnp.maximum(d2, 0.0))                 # only per-pair sqrt
            eq = labr_ref[...] == labc                         # (tm, tn)

            # Positive distances: lane-dense partial sums (no per-step XLU reduce).
            pos_acc[...] += _lane_group_sum(jnp.where(eq, d, 0.0), tn)

            # Remove the self-distance contribution only on tiles that intersect
            # the diagonal of the (B, B) matrix (tile-scoped iotas only).
            @pl.when(jnp.logical_and(i * tm < (j + 1) * tn, j * tn < (i + 1) * tm))
            def _diag():
                rowg = i * tm + lax.broadcasted_iota(jnp.int32, (tm, tn), 0)
                colg = j * tn + lax.broadcasted_iota(jnp.int32, (tm, tn), 1)
                self_mask = jnp.logical_and(eq, rowg == colg)
                pos_acc[...] -= _lane_group_sum(jnp.where(self_mask, d, 0.0), tn)

            # Stash negative-masked distances for pass 1.  +inf marks "not a
            # negative pair" (incl. diagonal and padded columns): it relu's to 0.
            neg = labr_ref[...] != labc
            if has_pad:
                neg = jnp.logical_and(neg, labc != _SENTINEL)
            strip[j] = jnp.where(neg, d, jnp.inf)

        @pl.when(jnp.logical_and(p == 0, j == last_j))
        def _finalize_pos():
            pos_row[...] = jnp.sum(pos_acc[...], axis=-1, keepdims=True)  # (tm, 1)

        @pl.when(p == 1)
        def _pass1():
            # VPU-only hinge over the VMEM strip; masked entries are -inf -> 0.
            hinge = jnp.maximum(jnp.float32(margin) + pos_row[...] - strip[j], 0.0)
            hinge_acc[...] += _lane_group_sum(hinge, tn)

        @pl.when(jnp.logical_and(p == 1, j == last_j))
        def _finalize_out():
            out_ref[...] = jnp.sum(hinge_acc[...], axis=-1, keepdims=True)

    return kernel


def multi_positive_ranking_loss(embeddings, labels, margin: float = 1.0):
    """embeddings: (B, D) float32/bfloat16, labels: (B,) int. Scalar f32 loss.

    Assumes every label appears exactly twice (the only regime in which the
    reference PyTorch module's .view(B, -1) is well formed).  Real labels must
    not equal int32 min (reserved as padding sentinel).
    """
    B, D = embeddings.shape

    # ---- TPU-friendly padding (never changes the result) --------------------
    d_pad = max(128, ((D + 127) // 128) * 128)      # lane-aligned feature dim
    b_pad = max(128, ((B + 127) // 128) * 128)      # padded rows masked out

    tn = next(t for t in (2048, 1024, 512, 256, 128) if b_pad % t == 0)
    strip_budget = 16 * 2 ** 20                     # keep strip modest (v7x: 64 MiB VMEM)
    max_tm = max(8, strip_budget // (4 * b_pad))
    tm = _pick_row_tile(b_pad, max_tm)
    cb = b_pad // tn
    # TODO(synk): for very large B*D the resident column operand would exceed
    # VMEM and a column-streamed variant would be needed; not required here.

    x = embeddings
    if (b_pad, d_pad) != (B, D):
        x = jnp.pad(x, ((0, b_pad - B), (0, d_pad - D)))
    has_pad = b_pad != B

    xf32 = x.astype(jnp.float32)
    sq = jnp.sum(xf32 * xf32, axis=-1)              # (b_pad,) f32 squared norms

    lab = labels.astype(jnp.int32)
    if has_pad:
        lab = jnp.concatenate(
            [lab, jnp.full((b_pad - B,), _SENTINEL, dtype=jnp.int32)])

    x_cols = x.reshape(cb, tn, d_pad)               # resident column operand
    lab_r = lab.reshape(b_pad, 1)
    lab_c = lab.reshape(cb, 1, tn)
    sq_r = sq.reshape(b_pad, 1)
    sq_c = sq.reshape(cb, 1, tn)

    # Full-precision f32 Gram (MXU multi-pass); bf16 inputs stay native bf16.
    precision = lax.Precision.HIGHEST if x.dtype == jnp.float32 else None

    grid = (b_pad // tm, 2, cb)

    in_specs = [
        pl.BlockSpec((tm, d_pad), lambda i, p, j: (i, 0)),         # X row tile
        pl.BlockSpec((cb, tn, d_pad), lambda i, p, j: (0, 0, 0)),  # X cols (resident)
        pl.BlockSpec((tm, 1), lambda i, p, j: (i, 0)),             # row labels
        pl.BlockSpec((cb, 1, tn), lambda i, p, j: (0, 0, 0)),      # col labels (resident)
        pl.BlockSpec((tm, 1), lambda i, p, j: (i, 0)),             # row |x|^2
        pl.BlockSpec((cb, 1, tn), lambda i, p, j: (0, 0, 0)),      # col |x|^2 (resident)
    ]
    out_spec = pl.BlockSpec((tm, 1), lambda i, p, j: (i, 0))

    itemsize = jnp.dtype(x.dtype).itemsize
    cost = pl.CostEstimate(
        flops=2 * b_pad * b_pad * d_pad,            # one Gram pass
        transcendentals=b_pad * b_pad,              # one sqrt per pair
        bytes_accessed=int(2 * b_pad * d_pad * itemsize + 5 * b_pad * 4),
    )

    row_hinge = pl.pallas_call(
        _make_kernel(tm, tn, float(margin), has_pad, precision),
        out_shape=jax.ShapeDtypeStruct((b_pad, 1), jnp.float32),
        grid_spec=pltpu.PrefetchScalarGridSpec(
            num_scalar_prefetch=0,
            grid=grid,
            in_specs=in_specs,
            out_specs=out_spec,
            scratch_shapes=[
                pltpu.VMEM((tm, 128), jnp.float32),    # pos partial sums (lane-dense)
                pltpu.VMEM((tm, 128), jnp.float32),    # hinge partial sums (lane-dense)
                pltpu.VMEM((tm, 1), jnp.float32),      # finalized pos(i)
                pltpu.VMEM((cb, tm, tn), jnp.float32), # row-block distance strip
            ],
        ),
        compiler_params=pltpu.CompilerParams(
            dimension_semantics=("parallel", "arbitrary", "arbitrary"),
            vmem_limit_bytes=48 * 1024 * 1024,
        ),
        cost_estimate=cost,
    )(x, x_cols, lab_r, lab_c, sq_r, sq_c)

    # Exactly one positive per row  ->  B - 2 negatives per row (B*(B-2) total).
    n_neg = float(B * (B - 2))
    return jnp.sum(row_hinge[:B, 0]) / n_neg


def _reference_loss(embeddings, labels, margin: float = 1.0):
    # Pure-JAX reference (same pairs-in-batch regime as the PyTorch module).
    x = embeddings.astype(jnp.float32)
    b = x.shape[0]
    d = jnp.sqrt(jnp.maximum(
        jnp.sum((x[:, None, :] - x[None, :, :]) ** 2, axis=-1), 0.0))
    eq = labels[:, None] == labels[None, :]
    pos_mask = eq & ~jnp.eye(b, dtype=bool)
    neg_mask = ~eq
    pos = jnp.sum(jnp.where(pos_mask, d, 0.0), axis=-1, keepdims=True)
    hinge = jnp.maximum(margin + pos - d, 0.0)
    return jnp.sum(jnp.where(neg_mask, hinge, 0.0)) / jnp.sum(neg_mask)


if __name__ == "__main__":
    key = jax.random.PRNGKey(0)
    k1, k2, k3 = jax.random.split(key, 3)

    # Small case (B=8, D=32): exercises batch/feature padding + sentinel masking.
    B1, D1 = 8, 32
    emb1 = jax.random.normal(k1, (B1, D1), dtype=jnp.float32)
    lab1 = jnp.array([0, 0, 1, 1, 2, 2, 3, 3], dtype=jnp.int32)
    loss1 = jax.block_until_ready(multi_positive_ranking_loss(emb1, lab1, margin=1.0))
    ref1 = _reference_loss(emb1, lab1, margin=1.0)
    # Tolerance is loose enough for any MXU f32 precision mode but far tighter
    # than any semantic error (wrong mask / denominator would be >> 1%).
    assert jnp.allclose(loss1, ref1, rtol=2e-3, atol=2e-3), (loss1, ref1)

    # Larger case (B=384, D=96): 3x2x3 grid (row blocks x passes x col blocks),
    # no batch padding, labels permuted so positives land in arbitrary tiles.
    B2, D2 = 384, 96
    emb2 = jax.random.normal(k2, (B2, D2), dtype=jnp.float32)
    lab2 = jnp.repeat(jnp.arange(B2 // 2, dtype=jnp.int32), 2)
    lab2 = lab2[jax.random.permutation(k3, B2)]
    loss2 = jax.block_until_ready(multi_positive_ranking_loss(emb2, lab2, margin=1.0))
    ref2 = _reference_loss(emb2, lab2, margin=1.0)
    assert jnp.allclose(loss2, ref2, rtol=2e-3, atol=2e-3), (loss2, ref2)

    print("KERNEL_OK")
</pallas_src>

<mosaic_0001>
module attributes {stable_mosaic.version = 11 : i64} {
  func.func @kernel(%arg0: i32, %arg1: i32, %arg2: i32, %arg3: memref<64x128xf32, #tpu.memory_space<vmem>>, %arg4: memref<1x128x128xf32, #tpu.memory_space<vmem>>, %arg5: memref<64x1xi32, #tpu.memory_space<vmem>>, %arg6: memref<1x1x128xi32, #tpu.memory_space<vmem>>, %arg7: memref<64x1xf32, #tpu.memory_space<vmem>>, %arg8: memref<1x1x128xf32, #tpu.memory_space<vmem>>, %arg9: memref<64x1xf32, #tpu.memory_space<vmem>>, %arg10: memref<64x128xf32, #tpu.memory_space<vmem>>, %arg11: memref<64x128xf32, #tpu.memory_space<vmem>>, %arg12: memref<64x1xf32, #tpu.memory_space<vmem>>, %arg13: memref<1x64x128xf32, #tpu.memory_space<vmem>>) attributes {dimension_semantics = [#tpu.dimension_semantics<parallel>, #tpu.dimension_semantics<arbitrary>, #tpu.dimension_semantics<arbitrary>], iteration_bounds = array<i64: 2, 2, 1>, scalar_prefetch = 0 : i64, scratch_operands = 4 : i64, tpu.core_type = #tpu.core_type<tc>, window_params = [{transform_indices = @transform_0, window_bounds = array<i64: 64, 128>}, {pipeline_mode = #tpu.pipeline_mode<synchronous>, transform_indices = @transform_1, window_bounds = array<i64: 1, 128, 128>}, {transform_indices = @transform_2, window_bounds = array<i64: 64, 1>}, {pipeline_mode = #tpu.pipeline_mode<synchronous>, transform_indices = @transform_3, window_bounds = array<i64: 1, 1, 128>}, {transform_indices = @transform_4, window_bounds = array<i64: 64, 1>}, {pipeline_mode = #tpu.pipeline_mode<synchronous>, transform_indices = @transform_5, window_bounds = array<i64: 1, 1, 128>}, {transform_indices = @transform_6, window_bounds = array<i64: 64, 1>}]} {
    %c0_i32 = arith.constant 0 : i32
    %0 = arith.cmpi eq, %arg1, %c0_i32 : i32
    %c0_i32_0 = arith.constant 0 : i32
    %1 = arith.cmpi eq, %arg2, %c0_i32_0 : i32
    %2 = arith.andi %0, %1 : i1
    %3 = arith.extui %2 : i1 to i32
    %c0_i32_1 = arith.constant 0 : i32
    %4 = arith.cmpi ne, %3, %c0_i32_1 : i32
    scf.if %4 {
      %cst = arith.constant 0.000000e+00 : f32
      %21 = vector.broadcast %cst : f32 to vector<64x128xf32>
      %c0 = arith.constant 0 : index
      %c0_11 = arith.constant 0 : index
      %22 = vector.load %arg10[%c0, %c0_11] : memref<64x128xf32, #tpu.memory_space<vmem>>, vector<64x128xf32>
      tpu.vector_store %arg10[%c0, %c0_11], %21 {strides = array<i32>} : memref<64x128xf32, #tpu.memory_space<vmem>>, vector<64x128xf32>,
      %cst_12 = arith.constant 0.000000e+00 : f32
      %23 = vector.broadcast %cst_12 : f32 to vector<64x128xf32>
      %c0_13 = arith.constant 0 : index
      %c0_14 = arith.constant 0 : index
      %24 = vector.load %arg11[%c0_13, %c0_14] : memref<64x128xf32, #tpu.memory_space<vmem>>, vector<64x128xf32>
      tpu.vector_store %arg11[%c0_13, %c0_14], %23 {strides = array<i32>} : memref<64x128xf32, #tpu.memory_space<vmem>>, vector<64x128xf32>,
    } else {
    }
    %c0_i32_2 = arith.constant 0 : i32
    %5 = arith.cmpi eq, %arg1, %c0_i32_2 : i32
    %6 = arith.extui %5 : i1 to i32
    %c0_i32_3 = arith.constant 0 : i32
    %7 = arith.cmpi ne, %6, %c0_i32_3 : i32
    scf.if %7 {
      %c0 = arith.constant 0 : index
      %c0_11 = arith.constant 0 : index
      %21 = vector.load %arg3[%c0, %c0_11] : memref<64x128xf32, #tpu.memory_space<vmem>>, vector<64x128xf32>
      %22 = arith.index_cast %arg2 : i32 to index
      %c0_12 = arith.constant 0 : index
      %c0_13 = arith.constant 0 : index
      %23 = vector.load %arg4[%22, %c0_12, %c0_13] : memref<1x128x128xf32, #tpu.memory_space<vmem>>, vector<1x128x128xf32>
      %24 = vector.shape_cast %23 : vector<1x128x128xf32> to vector<128x128xf32>
      %cst = arith.constant dense<0.000000e+00> : vector<64x128xf32>
      %25 = tpu.matmul %21, %24, %cst {dimension_numbers = #tpu.dot_dimension_numbers<[1], [1], [0], [0], [0, 0, 1, 0], [], []>, precision = #tpu.contract_precision<fp32>} : vector<64x128xf32>, vector<128x128xf32>, vector<64x128xf32> -> vector<64x128xf32>
      %26 = arith.index_cast %arg2 : i32 to index
      %c0_14 = arith.constant 0 : index
      %c0_15 = arith.constant 0 : index
      %27 = vector.load %arg6[%26, %c0_14, %c0_15] : memref<1x1x128xi32, #tpu.memory_space<vmem>>, vector<1x1x128xi32>
      %28 = vector.shape_cast %27 : vector<1x1x128xi32> to vector<1x128xi32>
      %c0_16 = arith.constant 0 : index
      %c0_17 = arith.constant 0 : index
      %29 = vector.load %arg7[%c0_16, %c0_17] : memref<64x1xf32, #tpu.memory_space<vmem>>, vector<64x1xf32>
      %30 = arith.index_cast %arg2 : i32 to index
      %c0_18 = arith.constant 0 : index
      %c0_19 = arith.constant 0 : index
      %31 = vector.load %arg8[%30, %c0_18, %c0_19] : memref<1x1x128xf32, #tpu.memory_space<vmem>>, vector<1x1x128xf32>
      %32 = vector.shape_cast %31 : vector<1x1x128xf32> to vector<1x128xf32>
      %33 = vector.broadcast %29 : vector<64x1xf32> to vector<64x128xf32>
      %34 = vector.broadcast %32 : vector<1x128xf32> to vector<64x128xf32>
      %35 = arith.addf %33, %34 : vector<64x128xf32>
      %cst_20 = arith.constant 2.000000e+00 : f32
      %36 = vector.broadcast %cst_20 : f32 to vector<64x128xf32>
      %37 = arith.mulf %36, %25 : vector<64x128xf32>
      %38 = arith.subf %35, %37 : vector<64x128xf32>
      %cst_21 = arith.constant 0.000000e+00 : f32
      %39 = vector.broadcast %cst_21 : f32 to vector<64x128xf32>
      %40 = arith.maximumf %38, %39 : vector<64x128xf32>
      %41 = math.sqrt %40 : vector<64x128xf32>
      %c0_22 = arith.constant 0 : index
      %c0_23 = arith.constant 0 : index
      %42 = vector.load %arg5[%c0_22, %c0_23] : memref<64x1xi32, #tpu.memory_space<vmem>>, vector<64x1xi32>
      %43 = vector.broadcast %42 : vector<64x1xi32> to vector<64x128xi32>
      %44 = vector.broadcast %28 : vector<1x128xi32> to vector<64x128xi32>
      %45 = arith.cmpi eq, %43, %44 : vector<64x128xi32>
      %c0_24 = arith.constant 0 : index
      %c0_25 = arith.constant 0 : index
      %46 = vector.load %arg10[%c0_24, %c0_25] : memref<64x128xf32, #tpu.memory_space<vmem>>, vector<64x128xf32>
      %cst_26 = arith.constant 0.000000e+00 : f32
      %47 = vector.broadcast %cst_26 : f32 to vector<64x128xf32>
      %48 = arith.select %45, %41, %47 : vector<64x128xi1>, vector<64x128xf32>
      %49 = arith.addf %46, %48 : vector<64x128xf32>
      %c0_27 = arith.constant 0 : index
      %c0_28 = arith.constant 0 : index
      %50 = vector.load %arg10[%c0_27, %c0_28] : memref<64x128xf32, #tpu.memory_space<vmem>>, vector<64x128xf32>
      tpu.vector_store %arg10[%c0_27, %c0_28], %49 {strides = array<i32>} : memref<64x128xf32, #tpu.memory_space<vmem>>, vector<64x128xf32>,
      %c64_i32 = arith.constant 64 : i32
      %51 = arith.muli %arg0, %c64_i32 : i32
      %c1_i32_29 = arith.constant 1 : i32
      %52 = arith.addi %arg2, %c1_i32_29 : i32
      %c128_i32 = arith.constant 128 : i32
      %53 = arith.muli %52, %c128_i32 : i32
      %54 = arith.cmpi slt, %51, %53 : i32
      %c128_i32_30 = arith.constant 128 : i32
      %55 = arith.muli %arg2, %c128_i32_30 : i32
      %c1_i32_31 = arith.constant 1 : i32
      %56 = arith.addi %arg0, %c1_i32_31 : i32
      %c64_i32_32 = arith.constant 64 : i32
      %57 = arith.muli %56, %c64_i32_32 : i32
      %58 = arith.cmpi slt, %55, %57 : i32
      %59 = arith.andi %54, %58 : i1
      %60 = arith.extui %59 : i1 to i32
      %c0_i32_33 = arith.constant 0 : i32
      %61 = arith.cmpi ne, %60, %c0_i32_33 : i32
      scf.if %61 {
        %c64_i32_39 = arith.constant 64 : i32
        %76 = arith.muli %arg0, %c64_i32_39 : i32
        %77 = tpu.iota {dimensions = array<i32: 0>} : vector<64x128xi32>
        %78 = vector.broadcast %76 : i32 to vector<64x128xi32>
        %79 = arith.addi %78, %77 : vector<64x128xi32>
        %c128_i32_40 = arith.constant 128 : i32
        %80 = arith.muli %arg2, %c128_i32_40 : i32
        %81 = tpu.iota {dimensions = array<i32: 1>} : vector<64x128xi32>
        %82 = vector.broadcast %80 : i32 to vector<64x128xi32>
        %83 = arith.addi %82, %81 : vector<64x128xi32>
        %84 = arith.cmpi eq, %79, %83 : vector<64x128xi32>
        %85 = arith.andi %45, %84 : vector<64x128xi1>
        %c0_41 = arith.constant 0 : index
        %c0_42 = arith.constant 0 : index
        %86 = vector.load %arg10[%c0_41, %c0_42] : memref<64x128xf32, #tpu.memory_space<vmem>>, vector<64x128xf32>
        %cst_43 = arith.constant 0.000000e+00 : f32
        %87 = vector.broadcast %cst_43 : f32 to vector<64x128xf32>
        %88 = arith.select %85, %41, %87 : vector<64x128xi1>, vector<64x128xf32>
        %89 = arith.subf %86, %88 : vector<64x128xf32>
        %c0_44 = arith.constant 0 : index
        %c0_45 = arith.constant 0 : index
        %90 = vector.load %arg10[%c0_44, %c0_45] : memref<64x128xf32, #tpu.memory_space<vmem>>, vector<64x128xf32>
        tpu.vector_store %arg10[%c0_44, %c0_45], %89 {strides = array<i32>} : memref<64x128xf32, #tpu.memory_space<vmem>>, vector<64x128xf32>,
      } else {
      }
      %c0_34 = arith.constant 0 : index
      %c0_35 = arith.constant 0 : index
      %62 = vector.load %arg5[%c0_34, %c0_35] : memref<64x1xi32, #tpu.memory_space<vmem>>, vector<64x1xi32>
      %63 = vector.broadcast %62 : vector<64x1xi32> to vector<64x128xi32>
      %64 = vector.broadcast %28 : vector<1x128xi32> to vector<64x128xi32>
      %65 = arith.cmpi ne, %63, %64 : vector<64x128xi32>
      %c-2147483648_i32 = arith.constant -2147483648 : i32
      %66 = vector.broadcast %c-2147483648_i32 : i32 to vector<1x128xi32>
      %67 = arith.cmpi ne, %28, %66 : vector<1x128xi32>
      %68 = vector.broadcast %67 : vector<1x128xi1> to vector<64x128xi1>
      %69 = arith.andi %65, %68 : vector<64x128xi1>
      %cst_36 = arith.constant 0x7F800000 : f32
      %70 = vector.broadcast %cst_36 : f32 to vector<64x128xf32>
      %71 = arith.select %69, %41, %70 : vector<64x128xi1>, vector<64x128xf32>
      %72 = arith.index_cast %arg2 : i32 to index
      %c0_37 = arith.constant 0 : index
      %c0_38 = arith.constant 0 : index
      %73 = vector.load %arg13[%72, %c0_37, %c0_38] : memref<1x64x128xf32, #tpu.memory_space<vmem>>, vector<1x64x128xf32>
      %74 = vector.shape_cast %73 : vector<1x64x128xf32> to vector<64x128xf32>
      %75 = vector.shape_cast %71 : vector<64x128xf32> to vector<1x64x128xf32>
      tpu.vector_store %arg13[%72, %c0_37, %c0_38], %75 {strides = array<i32>} : memref<1x64x128xf32, #tpu.memory_space<vmem>>, vector<1x64x128xf32>,
    } else {
    }
    %c0_i32_4 = arith.constant 0 : i32
    %8 = arith.cmpi eq, %arg1, %c0_i32_4 : i32
    %c0_i32_5 = arith.constant 0 : i32
    %9 = arith.cmpi eq, %arg2, %c0_i32_5 : i32
    %10 = arith.andi %8, %9 : i1
    %11 = arith.extui %10 : i1 to i32
    %c0_i32_6 = arith.constant 0 : i32
    %12 = arith.cmpi ne, %11, %c0_i32_6 : i32
    scf.if %12 {
      %c0 = arith.constant 0 : index
      %c0_11 = arith.constant 0 : index
      %21 = vector.load %arg10[%c0, %c0_11] : memref<64x128xf32, #tpu.memory_space<vmem>>, vector<64x128xf32>
      %cst = arith.constant dense<0.000000e+00> : vector<64xf32>
      %22 = vector.multi_reduction <add>, %21, %cst [1] : vector<64x128xf32> to vector<64xf32>
      %23 = vector.shape_cast %22 : vector<64xf32> to vector<64x1xf32>
      %c0_12 = arith.constant 0 : index
      %c0_13 = arith.constant 0 : index
      %24 = vector.load %arg12[%c0_12, %c0_13] : memref<64x1xf32, #tpu.memory_space<vmem>>, vector<64x1xf32>
      tpu.vector_store %arg12[%c0_12, %c0_13], %23 {strides = array<i32>} : memref<64x1xf32, #tpu.memory_space<vmem>>, vector<64x1xf32>,
    } else {
    }
    %c1_i32 = arith.constant 1 : i32
    %13 = arith.cmpi eq, %arg1, %c1_i32 : i32
    %14 = arith.extui %13 : i1 to i32
    %c0_i32_7 = arith.constant 0 : i32
    %15 = arith.cmpi ne, %14, %c0_i32_7 : i32
    scf.if %15 {
      %c0 = arith.constant 0 : index
      %c0_11 = arith.constant 0 : index
      %21 = vector.load %arg12[%c0, %c0_11] : memref<64x1xf32, #tpu.memory_space<vmem>>, vector<64x1xf32>
      %cst = arith.constant 1.000000e+00 : f32
      %22 = vector.broadcast %cst : f32 to vector<64x1xf32>
      %23 = arith.addf %22, %21 : vector<64x1xf32>
      %24 = arith.index_cast %arg2 : i32 to index
      %c0_12 = arith.constant 0 : index
      %c0_13 = arith.constant 0 : index
      %25 = vector.load %arg13[%24, %c0_12, %c0_13] : memref<1x64x128xf32, #tpu.memory_space<vmem>>, vector<1x64x128xf32>
      %26 = vector.shape_cast %25 : vector<1x64x128xf32> to vector<64x128xf32>
      %27 = vector.broadcast %23 : vector<64x1xf32> to vector<64x128xf32>
      %28 = arith.subf %27, %26 : vector<64x128xf32>
      %cst_14 = arith.constant 0.000000e+00 : f32
      %29 = vector.broadcast %cst_14 : f32 to vector<64x128xf32>
      %30 = arith.maximumf %28, %29 : vector<64x128xf32>
      %c0_15 = arith.constant 0 : index
      %c0_16 = arith.constant 0 : index
      %31 = vector.load %arg11[%c0_15, %c0_16] : memref<64x128xf32, #tpu.memory_space<vmem>>, vector<64x128xf32>
      %32 = arith.addf %31, %30 : vector<64x128xf32>
      %c0_17 = arith.constant 0 : index
      %c0_18 = arith.constant 0 : index
      %33 = vector.load %arg11[%c0_17, %c0_18] : memref<64x128xf32, #tpu.memory_space<vmem>>, vector<64x128xf32>
      tpu.vector_store %arg11[%c0_17, %c0_18], %32 {strides = array<i32>} : memref<64x128xf32, #tpu.memory_space<vmem>>, vector<64x128xf32>,
    } else {
    }
    %c1_i32_8 = arith.constant 1 : i32
    %16 = arith.cmpi eq, %arg1, %c1_i32_8 : i32
    %c0_i32_9 = arith.constant 0 : i32
    %17 = arith.cmpi eq, %arg2, %c0_i32_9 : i32
    %18 = arith.andi %16, %17 : i1
    %19 = arith.extui %18 : i1 to i32
    %c0_i32_10 = arith.constant 0 : i32
    %20 = arith.cmpi ne, %19, %c0_i32_10 : i32
    scf.if %20 {
      %c0 = arith.constant 0 : index
      %c0_11 = arith.constant 0 : index
      %21 = vector.load %arg11[%c0, %c0_11] : memref<64x128xf32, #tpu.memory_space<vmem>>, vector<64x128xf32>
      %cst = arith.constant dense<0.000000e+00> : vector<64xf32>
      %22 = vector.multi_reduction <add>, %21, %cst [1] : vector<64x128xf32> to vector<64xf32>
      %23 = vector.shape_cast %22 : vector<64xf32> to vector<64x1xf32>
      %c0_12 = arith.constant 0 : index
      %c0_13 = arith.constant 0 : index
      %24 = vector.load %arg9[%c0_12, %c0_13] : memref<64x1xf32, #tpu.memory_space<vmem>>, vector<64x1xf32>
      tpu.vector_store %arg9[%c0_12, %c0_13], %23 {strides = array<i32>} : memref<64x1xf32, #tpu.memory_space<vmem>>, vector<64x1xf32>,
    } else {
    }
    return
  }
  func.func @transform_0(%arg0: i32, %arg1: i32, %arg2: i32) -> (i32, i32) {
    %c0_i32 = arith.constant 0 : i32
    %c0_i32_0 = arith.constant 0 : i32
    return %arg0, %c0_i32 : i32, i32
  }
  func.func @transform_1(%arg0: i32, %arg1: i32, %arg2: i32) -> (i32, i32, i32) {
    %c0_i32 = arith.constant 0 : i32
    %c0_i32_0 = arith.constant 0 : i32
    %c0_i32_1 = arith.constant 0 : i32
    %c0_i32_2 = arith.constant 0 : i32
    return %c0_i32, %c0_i32_0, %c0_i32_1 : i32, i32, i32
  }
  func.func @transform_2(%arg0: i32, %arg1: i32, %arg2: i32) -> (i32, i32) {
    %c0_i32 = arith.constant 0 : i32
    %c0_i32_0 = arith.constant 0 : i32
    return %arg0, %c0_i32 : i32, i32
  }
  func.func @transform_3(%arg0: i32, %arg1: i32, %arg2: i32) -> (i32, i32, i32) {
    %c0_i32 = arith.constant 0 : i32
    %c0_i32_0 = arith.constant 0 : i32
    %c0_i32_1 = arith.constant 0 : i32
    %c0_i32_2 = arith.constant 0 : i32
    return %c0_i32, %c0_i32_0, %c0_i32_1 : i32, i32, i32
  }
  func.func @transform_4(%arg0: i32, %arg1: i32, %arg2: i32) -> (i32, i32) {
    %c0_i32 = arith.constant 0 : i32
    %c0_i32_0 = arith.constant 0 : i32
    return %arg0, %c0_i32 : i32, i32
  }
  func.func @transform_5(%arg0: i32, %arg1: i32, %arg2: i32) -> (i32, i32, i32) {
    %c0_i32 = arith.constant 0 : i32
    %c0_i32_0 = arith.constant 0 : i32
    %c0_i32_1 = arith.constant 0 : i32
    %c0_i32_2 = arith.constant 0 : i32
    return %c0_i32, %c0_i32_0, %c0_i32_1 : i32, i32, i32
  }
  func.func @transform_6(%arg0: i32, %arg1: i32, %arg2: i32) -> (i32, i32) {
    %c0_i32 = arith.constant 0 : i32
    %c0_i32_0 = arith.constant 0 : i32
    return %arg0, %c0_i32 : i32, i32
  }
}

</mosaic_0001>

<bundles_post_ra>
// kernel: tpu_custom_call.1
= control target key start
LH: loop header
LB: loop body
LE: loop exit
PB: predicated region body
PF: predicated region fallthrough
CT: control target
= control target key end

     0   :  { %s1825_s21 = smov 0   ;;  %s1827_s22 = smov 0   ;;  %s2548_s0 = inlined_call_operand.vmem [shape: f32[128,128], index: 0, kind: input, shape index: {}]   ;;  %s2549_s1 = inlined_call_operand.vmem [shape: f32[1,128,128], index: 1, kind: input, shape index: {}]   ;;  %s2550_s2 = inlined_call_operand.vmem [shape: s32[128,1], index: 2, kind: input, shape index: {}]   ;;  %s2551_s3 = inlined_call_operand.vmem [shape: s32[1,1,128], index: 3, kind: input, shape index: {}]   ;;  %s2552_s4 = inlined_call_operand.vmem [shape: f32[128,1], index: 4, kind: input, shape index: {}]   ;;  %s2553_s5 = inlined_call_operand.vmem [shape: f32[1,1,128], index: 5, kind: input, shape index: {}]   ;;  %s2554_s6 = inlined_call_operand.vmem [shape: f32[128,1], index: 6, kind: output, shape index: {}]  }
   0x1   :  { %s1829_s23 = smov 0   ;;  %s1831_s24 = smov 0  }
   0x2   :  { %s1833_s25 = smov 0  }
   0x3 LB: > { %s31_s26 = sadd.s32 1, %s1777_s23  ;;  %s35_s27 = sadd.s32 1, %s1781_s24  ;;  %s1785_s25 = sphi %s1833_s25, %s16_s25   ;;  %s1781_s24 = sphi %s1831_s24, %s2561_s24   ;;  %s1777_s23 = sphi %s1829_s23, %s2560_s23   ;;  %s1773_s22 = sphi %s1827_s22, %s2559_s22   ;;  %s1769_s21 = sphi %s1825_s21, %s2558_s21  }
   0x4   : > { %p33_p0 = scmp.ge.s32.totalorder %s31_s26, 2  ;;  %p1623_p1 = scmp.ge.s32.totalorder %s1785_s25, 1 }
   0x5   : > { %p254_p2 = scmp.lt.s32.totalorder %s1785_s25, 5 }
   0x6   : > { %s2563_s26 = smov (%p33_p0, %s31_s26), 0  ;;  %s2565_s27 = smov (!%p33_p0, %s35_s27), %s1781_s24 }
   0x7   : > { %p255_p3 = pnand %p1623_p1, %p254_p2  ;;  %p37_p4 = scmp.ge.s32.totalorder %s2565_s27, 2 }
   0x8   : > { %s1624_s28 = sshll.u32 (!%p255_p3), %s1773_s22, 3  ;;  %p318_p5 = scmp.eq.s32.totalorder (!%p255_p3), %s1769_s21, 0 }
   0x9   : > { %s2567_s27 = smov (%p37_p4, %s2565_s27), 0  ;;  %258 = sbr.rel (%p255_p3) target bundleno = 940 (0x3ac), region = 44 }
   0xa   : > { %p295_p6 = scmp.lt.s32.totalorder (!%p255_p3), %s1624_s28, 15 }
   0xe   : > { %s2569_s28 = smov (!%p295_p6, %s1624_s28), 15  ;;  %323 = sbr.rel (!%p318_p5) target bundleno = 31 (0x1f), region = 48  ;;  %v1787_v0 = vmov (%p318_p5), 0.0  }
   0xf   : > { %s1625_s29 = sshll.u32 %s2569_s28, 3  ;;  %324 = vst [vmem:[#allocation2 + $0x30] sm:$0xff] (%p318_p5), %v1787_v0 }
  0x10   : > { %s1864_s8 = scalar_lea.vmem %s2548_s0, %s1625_s29  ;;  %s1869_s11 = scalar_lea.vmem %s2550_s2, %s1625_s29  ;;  %325 = vst [vmem:[#allocation2] sm:$0xff] (%p318_p5), %v1787_v0 }
  0x11   : > { %s1874_s14 = scalar_lea.vmem %s2552_s4, %s1625_s29  ;;  %s1879_s17 = scalar_lea.vmem %s2554_s6, %s1625_s29  ;;  %326 = vst [vmem:[#allocation2 + $0x18] sm:$0xff] (%p318_p5), %v1787_v0 }
  0x12   : > { %327 = vst [vmem:[#allocation2 + $0x10] sm:$0xff] (%p318_p5), %v1787_v0 }
  0x13   : > { %328 = vst [vmem:[#allocation2 + $0x8] sm:$0xff] %v1787_v0 }
  0x14   : > { %329 = vst [vmem:[#allocation2 + $0x20] sm:$0xff] %v1787_v0 }
  0x15   : > { %330 = vst [vmem:[#allocation2 + $0x28] sm:$0xff] %v1787_v0 }
  0x16   : > { %331 = vst [vmem:[#allocation2 + $0x38] sm:$0xff] %v1787_v0 }
  0x17   : > { %332 = vst [vmem:[#allocation3] sm:$0xff] %v1787_v0 }
  0x18   : > { %333 = vst [vmem:[#allocation3 + $0x18] sm:$0xff] %v1787_v0 }
  0x19   : > { %334 = vst [vmem:[#allocation3 + $0x10] sm:$0xff] %v1787_v0 }
  0x1a   : > { %335 = vst [vmem:[#allocation3 + $0x20] sm:$0xff] %v1787_v0 }
  0x1b   : > { %336 = vst [vmem:[#allocation3 + $0x28] sm:$0xff] %v1787_v0 }
  0x1c   : > { %337 = vst [vmem:[#allocation3 + $0x8] sm:$0xff] %v1787_v0 }
  0x1d   : > { %338 = vst [vmem:[#allocation3 + $0x30] sm:$0xff] %v1787_v0 }
  0x1e   : > { %339 = vst [vmem:[#allocation3 + $0x38] sm:$0xff] %v1787_v0 }
  0x1f PF: > { %p1633_p7 = scmp.ne.s32.totalorder %s1769_s21, 0 }
  0x21   : > { %342 = sbr.rel (%p1633_p7) target bundleno = 521 (0x209), region = 52 }
  0x26   : > { %v368_v1 = vld [vmem:[%s2549_s1 + $0x78] sm:$0xff]  ;;  %v367_v2 = vld [vmem:[%s2549_s1 + $0x70] sm:$0xff]  ;;  %v366_v3 = vld [vmem:[%s2549_s1 + $0x68] sm:$0xff] }
  0x27   : > { %v1893_v4 = vand.u32 4294901760, %v368_v1  ;;  %v1895_v5 = vand.u32 4294901760, %v367_v2  ;;  %v1897_v6 = vand.u32 4294901760, %v366_v3  ;;  %v365_v7 = vld [vmem:[%s2549_s1 + $0x60] sm:$0xff]  ;;  %v364_v12 = vld [vmem:[%s2549_s1 + $0x58] sm:$0xff]  ;;  %v363_v20 = vld [vmem:[%s2549_s1 + $0x50] sm:$0xff] }
  0x28   : > { %v1907_v11 = vand.u32 4294901760, %v365_v7  ;;  %v1916_v15 = vand.u32 4294901760, %v364_v12  ;;  %v1928_v22 = vand.u32 4294901760, %v363_v20  ;;  %v362_v27 = vld [vmem:[%s2549_s1 + $0x48] sm:$0xff]  ;;  %v361_v33 = vld [vmem:[%s2549_s1 + $0x40] sm:$0xff]  ;;  %v360_v39 = vld [vmem:[%s2549_s1 + $0x38] sm:$0xff] }
  0x29   : > { %370 = vmatpush.xpose.msra.mxu0 %v1893_v4  ;;  %v467_v8 = vsub.f32 %v368_v1, %v1893_v4  ;;  %685 = vmatpush.xpose.msra.mxu3 %v1893_v4  ;;  %v473_v9 = vsub.f32 %v367_v2, %v1895_v5  ;;  %v479_v10 = vsub.f32 %v366_v3, %v1897_v6  ;;  %v1939_v28 = vand.u32 4294901760, %v362_v27  ;;  %v359_v45 = vld [vmem:[%s2549_s1 + $0x30] sm:$0xff]  ;;  %v358_v51 = vld [vmem:[%s2549_s1 + $0x28] sm:$0xff]  ;;  %v357_v57 = vld [vmem:[%s2549_s1 + $0x20] sm:$0xff] }
  0x2a   : > { %v485_v18 = vsub.f32 %v365_v7, %v1907_v11  ;;  %v491_v25 = vsub.f32 %v364_v12, %v1916_v15  ;;  %v497_v31 = vsub.f32 %v363_v20, %v1928_v22  ;;  %v1950_v34 = vand.u32 4294901760, %v361_v33  ;;  %v356_v63 = vld [vmem:[%s2549_s1 + $0x18] sm:$0xff]  ;;  %v354_v20 = vld [vmem:[%s2549_s1 + $0x8] sm:$0xff] }
  0x2b   : > { %597 = vmatpush.xpose.msra.mxu2 %v467_v8  ;;  %v1912_v13 = vand.u32 4294901760, %v467_v8  ;;  %v1914_v14 = vand.u32 4294901760, %v473_v9  ;;  %v1923_v19 = vand.u32 4294901760, %v479_v10  ;;  %v503_v37 = vsub.f32 %v362_v27, %v1939_v28 }
  0x2c   : > { %v1933_v26 = vand.u32 4294901760, %v485_v18  ;;  %v1944_v32 = vand.u32 4294901760, %v491_v25  ;;  %v1955_v38 = vand.u32 4294901760, %v497_v31  ;;  %v1961_v40 = vand.u32 4294901760, %v360_v39 }
  0x2d   : > { %372 = vmatpush.xpose.msra.mxu0 %v1895_v5  ;;  %v469_v16 = vsub.f32 %v467_v8, %v1912_v13  ;;  %687 = vmatpush.xpose.msra.mxu3 %v1895_v5  ;;  %v475_v17 = vsub.f32 %v473_v9, %v1914_v14  ;;  %v481_v24 = vsub.f32 %v479_v10, %v1923_v19  ;;  %v1966_v44 = vand.u32 4294901760, %v503_v37  ;;  %v355_v8 = vld [vmem:[%s2549_s1 + $0x10] sm:$0xff] }
  0x2e   : > { %v487_v30 = vsub.f32 %v485_v18, %v1933_v26  ;;  %v493_v36 = vsub.f32 %v491_v25, %v1944_v32  ;;  %v499_v42 = vsub.f32 %v497_v31, %v1955_v38  ;;  %v509_v43 = vsub.f32 %v361_v33, %v1950_v34 }
  0x2f   : > { %600 = vmatpush.xpose.msra.mxu2 %v473_v9  ;;  %v470_v21 = vand.u32 4294901760, %v469_v16  ;;  %v476_v23 = vand.u32 4294901760, %v475_v17  ;;  %v482_v29 = vand.u32 4294901760, %v481_v24  ;;  %v515_v46 = vsub.f32 %v360_v39, %v1961_v40 }
  0x30   : > { %v488_v35 = vand.u32 4294901760, %v487_v30  ;;  %v494_v41 = vand.u32 4294901760, %v493_v36  ;;  %v500_v47 = vand.u32 4294901760, %v499_v42  ;;  %v505_v48 = vsub.f32 %v503_v37, %v1966_v44  ;;  %v353_v30 = vld [vmem:[%s2549_s1] sm:$0xff] }
  0x31   : > { %374 = vmatpush.xpose.msra.mxu0 %v1897_v6  ;;  %471 = vmatpush.xpose.msra.mxu1 %v470_v21  ;;  %v1975_v49 = vand.u32 4294901760, %v359_v45  ;;  %v1977_v50 = vand.u32 4294901760, %v509_v43  ;;  %v1983_v52 = vand.u32 4294901760, %v358_v51  ;;  %v1988_v56 = vand.u32 4294901760, %v515_v46 }
  0x32   : > { %689 = vmatpush.xpose.msra.mxu3 %v1897_v6  ;;  %v506_v53 = vand.u32 4294901760, %v505_v48  ;;  %v1994_v58 = vand.u32 4294901760, %v357_v57  ;;  %v2008_v3 = vand.u32 4294901760, %v356_v63  ;;  %v2021_v17 = vand.u32 4294901760, %v355_v8 }
  0x33   : > { %603 = vmatpush.xpose.msra.mxu2 %v479_v10  ;;  %v511_v54 = vsub.f32 %v509_v43, %v1977_v50  ;;  %v521_v55 = vsub.f32 %v359_v45, %v1975_v49  ;;  %v517_v60 = vsub.f32 %v515_v46, %v1988_v56  ;;  %v527_v61 = vsub.f32 %v358_v51, %v1983_v52 }
  0x34   : > { %v533_v0 = vsub.f32 %v357_v57, %v1994_v58  ;;  %v539_v16 = vsub.f32 %v356_v63, %v2008_v3  ;;  %v2033_v27 = vand.u32 4294901760, %v354_v20 }
  0x35   : > { %376 = vmatpush.xpose.msra.mxu0 %v1907_v11  ;;  %477 = vmatpush.xpose.msra.mxu1 %v476_v23  ;;  %v512_v59 = vand.u32 4294901760, %v511_v54  ;;  %v1999_v62 = vand.u32 4294901760, %v521_v55  ;;  %v518_v1 = vand.u32 4294901760, %v517_v60  ;;  %v2010_v7 = vand.u32 4294901760, %v527_v61 }
  0x36   : > { %691 = vmatpush.xpose.msra.mxu3 %v1907_v11  ;;  %v2016_v9 = vand.u32 4294901760, %v533_v0  ;;  %v551_v36 = vsub.f32 %v354_v20, %v2033_v27 }
  0x37   : > { %606 = vmatpush.xpose.msra.mxu2 %v485_v18  ;;  %v523_v2 = vsub.f32 %v521_v55, %v1999_v62  ;;  %v529_v12 = vsub.f32 %v527_v61, %v2010_v7  ;;  %v343_v18 = vld [vmem:[%s1864_s8] sm:$0xff] }
  0x38   : > { %v535_v21 = vsub.f32 %v533_v0, %v2016_v9  ;;  %v2029_v23 = vand.u32 4294901760, %v343_v18  ;;  %v2056_v48 = vand.u32 4294901760, %v551_v36 }
  0x39   : > { %378 = vmatpush.xpose.msra.mxu0 %v1916_v15  ;;  %483 = vmatpush.xpose.msra.mxu1 %v482_v29  ;;  %v524_v10 = vand.u32 4294901760, %v523_v2  ;;  %v530_v24 = vand.u32 4294901760, %v529_v12  ;;  %v2035_v29 = vand.u32 4294901760, %v539_v16  ;;  %v346_v12 = vld [vmem:[%s1864_s8 + $0x18] sm:$0xff] }
  0x3a   : > { %693 = vmatpush.xpose.msra.mxu3 %v1916_v15  ;;  %v402_v33 = vsub.f32 %v343_v18, %v2029_v23  ;;  %v2079_v20 = vand.u32 4294901760, %v346_v12 }
  0x3b   : > { %609 = vmatpush.xpose.msra.mxu2 %v491_v25  ;;  %v545_v25 = vsub.f32 %v355_v8, %v2021_v17 }
  0x3c   : > { %v403_v42 = vand.u32 4294901760, %v402_v33 }
  0x3d   : > { %380 = vmatpush.xpose.msra.mxu0 %v1928_v22  ;;  %489 = vmatpush.xpose.msra.mxu1 %v488_v35  ;;  %v541_v35 = vsub.f32 %v539_v16, %v2035_v29  ;;  %v2047_v39 = vand.u32 4294901760, %v545_v25 }
  0x3e   : > { %695 = vmatpush.xpose.msra.mxu3 %v1928_v22  ;;  %v404_v51 = vsub.f32 %v402_v33, %v403_v42 }
  0x3f   : > { %612 = vmatpush.xpose.msra.mxu2 %v497_v31  ;;  %v536_v31 = vand.u32 4294901760, %v535_v21  ;;  %v542_v45 = vand.u32 4294901760, %v541_v35  ;;  %v426_v21 = vsub.f32 %v346_v12, %v2079_v20 }
  0x40   : > { %v405_v60 = vand.u32 4294901760, %v404_v51 }
  0x41   : > { %382 = vmatpush.xpose.msra.mxu0 %v1939_v28  ;;  %495 = vmatpush.xpose.msra.mxu1 %v494_v41  ;;  %v344_v41 = vld [vmem:[%s1864_s8 + $0x8] sm:$0xff] }
  0x42   : > { %697 = vmatpush.xpose.msra.mxu3 %v1939_v28 }
  0x43   : > { %615 = vmatpush.xpose.msra.mxu2 %v503_v37  ;;  %v2045_v37 = vand.u32 4294901760, %v353_v30 }
  0x45   : > { %384 = vmatpush.xpose.msra.mxu0 %v1950_v34  ;;  %501 = vmatpush.xpose.msra.mxu1 %v500_v47  ;;  %v557_v47 = vsub.f32 %v353_v30, %v2045_v37  ;;  %v348_v30 = vld [vmem:[%s1864_s8 + $0x28] sm:$0xff] }
  0x46   : > { %699 = vmatpush.xpose.msra.mxu3 %v1950_v34 }
  0x47   : > { %618 = vmatpush.xpose.msra.mxu2 %v509_v43  ;;  %v2051_v43 = vand.u32 4294901760, %v344_v41  ;;  %v2062_v57 = vand.u32 4294901760, %v557_v47 }
  0x49   : > { %386 = vmatpush.xpose.msra.mxu0 %v1961_v40  ;;  %507 = vmatpush.xpose.msra.mxu1 %v506_v53  ;;  %v410_v53 = vsub.f32 %v344_v41, %v2051_v43 }
  0x4a   : > { %701 = vmatpush.xpose.msra.mxu3 %v1961_v40 }
  0x4b   : > { %621 = vmatpush.xpose.msra.mxu2 %v515_v46  ;;  %v547_v46 = vsub.f32 %v545_v25, %v2047_v39 }
  0x4d   : > { %388 = vmatpush.xpose.msra.mxu0 %v1975_v49  ;;  %513 = vmatpush.xpose.msra.mxu1 %v512_v59  ;;  %v548_v54 = vand.u32 4294901760, %v547_v46  ;;  %v345_v59 = vld [vmem:[%s1864_s8 + $0x10] sm:$0xff] }
  0x4e   : > { %703 = vmatpush.xpose.msra.mxu3 %v1975_v49  ;;  %v2066_v63 = vand.u32 4294901760, %v345_v59 }
  0x4f   : > { %624 = vmatpush.xpose.msra.mxu2 %v521_v55  ;;  %v553_v55 = vsub.f32 %v551_v36, %v2056_v48 }
  0x50   : > { %v418_v8 = vsub.f32 %v345_v59, %v2066_v63 }
  0x51   : > { %390 = vmatpush.xpose.msra.mxu0 %v1983_v52  ;;  %519 = vmatpush.xpose.msra.mxu1 %v518_v1  ;;  %v559_v1 = vsub.f32 %v557_v47, %v2062_v57 }
  0x52   : > { %705 = vmatpush.xpose.msra.mxu3 %v1983_v52  ;;  %v419_v18 = vand.u32 4294901760, %v418_v8 }
  0x53   : > { %627 = vmatpush.xpose.msra.mxu2 %v527_v61  ;;  %v411_v61 = vand.u32 4294901760, %v410_v53 }
  0x55   : > { %392 = vmatpush.xpose.msra.mxu0 %v1994_v58  ;;  %525 = vmatpush.xpose.msra.mxu1 %v524_v10  ;;  %v412_v2 = vsub.f32 %v410_v53, %v411_v61  ;;  %v560_v10 = vand.u32 4294901760, %v559_v1 }
  0x56   : > { %707 = vmatpush.xpose.msra.mxu3 %v1994_v58 }
  0x57   : > { %630 = vmatpush.xpose.msra.mxu2 %v533_v0  ;;  %v554_v0 = vand.u32 4294901760, %v553_v55 }
  0x59   : > { %394 = vmatpush.xpose.msra.mxu0 %v2008_v3  ;;  %531 = vmatpush.xpose.msra.mxu1 %v530_v24  ;;  %v427_v24 = vand.u32 4294901760, %v426_v21 }
  0x5a   : > { %709 = vmatpush.xpose.msra.mxu3 %v2008_v3 }
  0x5b   : > { %633 = vmatpush.xpose.msra.mxu2 %v539_v16  ;;  %v413_v16 = vand.u32 4294901760, %v412_v2 }
  0x5d   : > { %396 = vmatpush.xpose.msra.mxu0 %v2021_v17  ;;  %537 = vmatpush.xpose.msra.mxu1 %v536_v31  ;;  %v2104_v31 = vand.u32 4294901760, %v348_v30 }
  0x5e   : > { %711 = vmatpush.xpose.msra.mxu3 %v2021_v17 }
  0x5f   : > { %636 = vmatpush.xpose.msra.mxu2 %v545_v25  ;;  %v442_v35 = vsub.f32 %v348_v30, %v2104_v31 }
  0x61   : > { %398 = vmatpush.xpose.msra.mxu0 %v2033_v27  ;;  %543 = vmatpush.xpose.msra.mxu1 %v542_v45  ;;  %v350_v45 = vld [vmem:[%s1864_s8 + $0x38] sm:$0xff] }
  0x62   : > { %713 = vmatpush.xpose.msra.mxu3 %v2033_v27  ;;  %v2137_v51 = vand.u32 4294901760, %v350_v45 }
  0x63   : > { %639 = vmatpush.xpose.msra.mxu2 %v551_v36  ;;  %v443_v36 = vand.u32 4294901760, %v442_v35 }
  0x65   : > { %400 = vmatpush.xpose.msra.mxu0 %v2045_v37  ;;  %549 = vmatpush.xpose.msra.mxu1 %v548_v54 }
  0x66   : > { %715 = vmatpush.xpose.msra.mxu3 %v2045_v37 }
  0x67   : > { %642 = vmatpush.xpose.msra.mxu2 %v557_v47 }
  0x68   : > { %406 = vmatmul.f32.vlgmr.msra.gmra.mxu0 %v405_v60 }
  0x69   : > { %768 = vmatpush.xpose.msrb.mxu0 %v1912_v13  ;;  %555 = vmatpush.xpose.msra.mxu1 %v554_v0 }
  0x6a   : > { %1661 = vmatpush.xpose.msrb.mxu3 %v1893_v4  ;;  %645 = vmatmul.f32.vlgmr.msra.gmra.mxu2 %v402_v33  ;;  %v1788_v33 = vmov 0  }
  0x6b   : > { %1645 = vmatpush.xpose.msrb.mxu2 %v1912_v13  ;;  %719 = vmatmul.f32.vlgmr.msra.gmra.mxu3 %v403_v42  ;;  %v420_v13 = vsub.f32 %v418_v8, %v419_v18  ;;  %v931_v42 = vld [vmem:[%s1874_s14 + $0x10] sm:$0xff] }
  0x6c   : > { %1720 = vset.pattern.permute.xlu0 %v1788_v33  ;;  %1721 = vset.pattern.permute.xlu1 %v1788_v33 }
  0x6d   : > { %772 = vmatpush.xpose.msrb.mxu0 %v1914_v14  ;;  %561 = vmatpush.xpose.msra.mxu1 %v560_v10 }
  0x6e   : > { %1662 = vmatpush.xpose.msrb.mxu3 %v1895_v5  ;;  %1722 = vset.pattern.permute.xlu2 %v1788_v33 }
  0x6f   : > { %1646 = vmatpush.xpose.msrb.mxu2 %v1914_v14  ;;  %v347_v14 = vld [vmem:[%s1864_s8 + $0x20] sm:$0xff]  ;;  %951 = vperm.xlu1 %1721, %v931_v42  }
  0x70   : > { %414 = vmatmul.f32.gmra.mxu0 %v413_v16  ;;  %563 = vmatmul.f32.vlgmr.msra.gmra.mxu1 %v2029_v23  ;;  %v2091_v25 = vand.u32 4294901760, %v347_v14 }
  0x71   : > { %776 = vmatpush.xpose.msrb.mxu0 %v1923_v19  ;;  %863 = vmatpush.xpose.msrb.mxu1 %v1893_v4  ;;  %v421_v4 = vand.u32 4294901760, %v420_v13  ;;  %v2221_v13 = vld [vmem:[%s2551_s3] sm:$0x1] }
  0x72   : > { %1663 = vmatpush.xpose.msrb.mxu3 %v1897_v6  ;;  %650 = vmatmul.f32.gmra.mxu2 %v410_v53  ;;  %v935_v53 = vld [vmem:[%s1874_s14 + $0x30] sm:$0xff] }
  0x73   : > { %1647 = vmatpush.xpose.msrb.mxu2 %v1923_v19  ;;  %725 = vmatmul.f32.gmra.mxu3 %v411_v61  ;;  %v428_v19 = vsub.f32 %v426_v21, %v427_v24 }
  0x75   : > { %780 = vmatpush.xpose.msrb.mxu0 %v1933_v26  ;;  %865 = vmatpush.xpose.msrb.mxu1 %v1895_v5  ;;  %v434_v5 = vsub.f32 %v347_v14, %v2091_v25 }
  0x76   : > { %1664 = vmatpush.xpose.msrb.mxu3 %v1907_v11 }
  0x77   : > { %1648 = vmatpush.xpose.msrb.mxu2 %v1933_v26  ;;  %v435_v26 = vand.u32 4294901760, %v434_v5 }
  0x78   : > { %422 = vmatmul.f32.gmra.mxu0 %v421_v4  ;;  %567 = vmatmul.f32.gmra.mxu1 %v2051_v43 }
  0x79   : > { %784 = vmatpush.xpose.msrb.mxu0 %v1944_v32  ;;  %867 = vmatpush.xpose.msrb.mxu1 %v1897_v6  ;;  %v429_v6 = vand.u32 4294901760, %v428_v19 }
  0x7a   : > { %1665 = vmatpush.xpose.msrb.mxu3 %v1916_v15  ;;  %655 = vmatmul.f32.gmra.mxu2 %v418_v8 }
  0x7b   : > { %1649 = vmatpush.xpose.msrb.mxu2 %v1944_v32  ;;  %731 = vmatmul.f32.gmra.mxu3 %v419_v18  ;;  %v929_v32 = vld [vmem:[%s1874_s14] sm:$0xff] }
  0x7c   : > { %941 = vperm.xlu0 %1720, %v929_v32  }
  0x7d   : > { %788 = vmatpush.xpose.msrb.mxu0 %v1955_v38  ;;  %869 = vmatpush.xpose.msrb.mxu1 %v1907_v11  ;;  %v436_v11 = vsub.f32 %v434_v5, %v435_v26 }
  0x7e   : > { %1666 = vmatpush.xpose.msrb.mxu3 %v1928_v22 }
  0x7f   : > { %1650 = vmatpush.xpose.msrb.mxu2 %v1955_v38  ;;  %v349_v38 = vld [vmem:[%s1864_s8 + $0x30] sm:$0xff]  ;;  %s2200_s8 = sshll.u32 %s1773_s22, 6 }
  0x80   : > { %430 = vmatmul.f32.gmra.mxu0 %v429_v6  ;;  %571 = vmatmul.f32.gmra.mxu1 %v2066_v63  ;;  %v2121_v41 = vand.u32 4294901760, %v349_v38  ;;  %p1186_p8 = scmp.lt.s32.totalorder %s2200_s8, 128 }
  0x81   : > { %792 = vmatpush.xpose.msrb.mxu0 %v1966_v44  ;;  %871 = vmatpush.xpose.msrb.mxu1 %v1916_v15  ;;  %v437_v15 = vand.u32 4294901760, %v436_v11 }
  0x82   : > { %1667 = vmatpush.xpose.msrb.mxu3 %v1939_v28  ;;  %660 = vmatmul.f32.gmra.mxu2 %v426_v21 }
  0x83   : > { %1651 = vmatpush.xpose.msrb.mxu2 %v1966_v44  ;;  %737 = vmatmul.f32.gmra.mxu3 %v427_v24  ;;  %v450_v44 = vsub.f32 %v349_v38, %v2121_v41 }
  0x85   : > { %796 = vmatpush.xpose.msrb.mxu0 %v1977_v50  ;;  %873 = vmatpush.xpose.msrb.mxu1 %v1928_v22  ;;  %v444_v22 = vsub.f32 %v442_v35, %v443_v36  ;;  %v451_v47 = vand.u32 4294901760, %v450_v44 }
  0x86   : > { %1668 = vmatpush.xpose.msrb.mxu3 %v1950_v34 }
  0x87   : > { %1652 = vmatpush.xpose.msrb.mxu2 %v1977_v50  ;;  %v930_v50 = vld [vmem:[%s1874_s14 + $0x8] sm:$0xff]  ;;  %v445_v46 = vand.u32 4294901760, %v444_v22 }
  0x88   : > { %438 = vmatmul.f32.gmra.mxu0 %v437_v15  ;;  %575 = vmatmul.f32.gmra.mxu1 %v2079_v20 }
  0x89   : > { %800 = vmatpush.xpose.msrb.mxu0 %v1988_v56  ;;  %875 = vmatpush.xpose.msrb.mxu1 %v1939_v28  ;;  %v932_v28 = vld [vmem:[%s1874_s14 + $0x18] sm:$0xff] }
  0x8a   : > { %1669 = vmatpush.xpose.msrb.mxu3 %v1961_v40  ;;  %665 = vmatmul.f32.gmra.mxu2 %v434_v5 }
  0x8b   : > { %1653 = vmatpush.xpose.msrb.mxu2 %v1988_v56  ;;  %743 = vmatmul.f32.gmra.mxu3 %v435_v26  ;;  %v458_v56 = vsub.f32 %v350_v45, %v2137_v51 }
  0x8c   : > { %946 = vperm.xlu0 %1720, %v930_v50   ;;  %956 = vperm.xlu1 %1721, %v932_v28   ;;  %v2234_v50 = vld [vmem:[%s2553_s5] ss:$0 sm:$0xff] }
  0x8d   : > { %804 = vmatpush.xpose.msrb.mxu0 %v1999_v62  ;;  %877 = vmatpush.xpose.msrb.mxu1 %v1950_v34  ;;  %v452_v34 = vsub.f32 %v450_v44, %v451_v47  ;;  %v459_v54 = vand.u32 4294901760, %v458_v56 }
  0x8e   : > { %1670 = vmatpush.xpose.msrb.mxu3 %v1975_v49 }
  0x8f   : > { %1654 = vmatpush.xpose.msrb.mxu2 %v1999_v62  ;;  %v453_v62 = vand.u32 4294901760, %v452_v34 }
  0x90   : > { %446 = vmatmul.f32.gmra.mxu0 %v445_v46  ;;  %579 = vmatmul.f32.gmra.mxu1 %v2091_v25 }
  0x91   : > { %808 = vmatpush.xpose.msrb.mxu0 %v2010_v7  ;;  %879 = vmatpush.xpose.msrb.mxu1 %v1961_v40  ;;  %v936_v40 = vld [vmem:[%s1874_s14 + $0x38] sm:$0xff] }
  0x92   : > { %1671 = vmatpush.xpose.msrb.mxu3 %v1983_v52  ;;  %670 = vmatmul.f32.gmra.mxu2 %v442_v35 }
  0x93   : > { %1655 = vmatpush.xpose.msrb.mxu2 %v2010_v7  ;;  %749 = vmatmul.f32.gmra.mxu3 %v443_v36  ;;  %v1111_v7 = vld [vmem:[%s1869_s11 + $0x8] sm:$0xff] }
  0x94   : > { %971 = vperm.xlu0 %1720, %v935_v53   ;;  %976 = vperm.xlu1 %1721, %v936_v40  }
  0x95   : > { %812 = vmatpush.xpose.msrb.mxu0 %v2016_v9  ;;  %881 = vmatpush.xpose.msrb.mxu1 %v1975_v49  ;;  %v460_v49 = vsub.f32 %v458_v56, %v459_v54 }
  0x96   : > { %1672 = vmatpush.xpose.msrb.mxu3 %v1994_v58 }
  0x97   : > { %1656 = vmatpush.xpose.msrb.mxu2 %v2016_v9  ;;  %v461_v9 = vand.u32 4294901760, %v460_v49 }
  0x98   : > { %454 = vmatmul.f32.gmra.mxu0 %v453_v62  ;;  %583 = vmatmul.f32.gmra.mxu1 %v2104_v31 }
  0x99   : > { %816 = vmatpush.xpose.msrb.mxu0 %v2035_v29  ;;  %883 = vmatpush.xpose.msrb.mxu1 %v1983_v52  ;;  %v1112_v52 = vld [vmem:[%s1869_s11 + $0x10] sm:$0xff] }
  0x9a   : > { %1673 = vmatpush.xpose.msrb.mxu3 %v2008_v3  ;;  %675 = vmatmul.f32.gmra.mxu2 %v450_v44 }
  0x9b   : > { %1657 = vmatpush.xpose.msrb.mxu2 %v2035_v29  ;;  %755 = vmatmul.f32.gmra.mxu3 %v451_v47  ;;  %v933_v29 = vld [vmem:[%s1874_s14 + $0x20] sm:$0xff] }
  0x9c   : > { %1122 = vperm.xlu0 %1720, %v1111_v7   ;;  %1125 = vperm.xlu1 %1721, %v1112_v52  }
  0x9d   : > { %820 = vmatpush.xpose.msrb.mxu0 %v2047_v39  ;;  %885 = vmatpush.xpose.msrb.mxu1 %v1994_v58  ;;  %v1114_v58 = vld [vmem:[%s1869_s11 + $0x20] sm:$0xff] }
  0x9e   : > { %1674 = vmatpush.xpose.msrb.mxu3 %v2021_v17  ;;  %961 = vperm.xlu2 %1722, %v933_v29  }
  0x9f   : > { %1658 = vmatpush.xpose.msrb.mxu2 %v2047_v39  ;;  %v1117_v39 = vld [vmem:[%s1869_s11 + $0x38] sm:$0xff] }
  0xa0   : > { %462 = vmatmul.f32.gmra.mxu0 %v461_v9  ;;  %587 = vmatmul.f32.gmra.mxu1 %v2121_v41 }
  0xa1   : > { %824 = vmatpush.xpose.msrb.mxu0 %v2056_v48  ;;  %887 = vmatpush.xpose.msrb.mxu1 %v2008_v3  ;;  %v1115_v3 = vld [vmem:[%s1869_s11 + $0x28] sm:$0xff] }
  0xa2   : > { %1675 = vmatpush.xpose.msrb.mxu3 %v2033_v27  ;;  %680 = vmatmul.f32.gmra.mxu2 %v458_v56 }
  0xa3   : > { %1659 = vmatpush.xpose.msrb.mxu2 %v2056_v48  ;;  %761 = vmatmul.f32.gmra.mxu3 %v459_v54 }
  0xa4   : > { %1131 = vperm.xlu0 %1720, %v1114_v58   ;;  %1134 = vperm.xlu1 %1721, %v1115_v3  }
  0xa5   : > { %828 = vmatpush.xpose.msrb.mxu0 %v2062_v57  ;;  %889 = vmatpush.xpose.msrb.mxu1 %v2021_v17  ;;  %v934_v17 = vld [vmem:[%s1874_s14 + $0x28] sm:$0xff]  ;;  %s1643_s14 = sadd.s32 64, %s2200_s8 }
  0xa6   : > { %1676 = vmatpush.xpose.msrb.mxu3 %v2045_v37  ;;  %966 = vperm.xlu2 %1722, %v934_v17   ;;  %p1636_p9 = scmp.gt.s32.totalorder %s1643_s14, 0 }
  0xa7   : > { %1660 = vmatpush.xpose.msrb.mxu2 %v2062_v57 }
  0xa8   : > { %591 = vmatmul.f32.gmra.mxu1 %v2137_v51  ;;  %830 = vmatmul.f32.vlgmr.msrb.gmra.mxu0 %v2029_v23  ;;  %p2204_p10 = pnand %p1636_p9, %p1186_p8 }
  0xa9   : > { %891 = vmatpush.xpose.msrb.mxu1 %v2033_v27  ;;  %v1110_v27 = vld [vmem:[%s1869_s11] sm:$0xff] }
  0xaa   : > { %846 = vmatmul.f32.vlgmr.msrb.gmra.mxu2 %v2091_v25 }
  0xab   : > { %911 = vmatmul.f32.vlgmr.msrb.gmra.mxu3 %v2091_v25 }
  0xac   : > { %1140 = vperm.xlu0 %1720, %v1117_v39  }
  0xad   : > { %893 = vmatpush.xpose.msrb.mxu1 %v2045_v37  ;;  %v1113_v37 = vld [vmem:[%s1869_s11 + $0x18] sm:$0xff] }
  0xae   : > { %1119 = vperm.xlu2 %1722, %v1110_v27  }
  0xb0   : > { %834 = vmatmul.f32.gmra.mxu0 %v2051_v43  ;;  %895 = vmatmul.f32.vlgmr.msrb.gmra.mxu1 %v2029_v23  ;;  %v1116_v23 = vld [vmem:[%s1869_s11 + $0x30] sm:$0xff] }
  0xb2   : > { %850 = vmatmul.f32.gmra.mxu2 %v2104_v31 }
  0xb3   : > { %915 = vmatmul.f32.gmra.mxu3 %v2104_v31 }
  0xb6   : > { %1128 = vperm.xlu2 %1722, %v1113_v37  }
  0xb8   : > { %838 = vmatmul.f32.gmra.mxu0 %v2066_v63  ;;  %899 = vmatmul.f32.gmra.mxu1 %v2051_v43 }
  0xba   : > { %854 = vmatmul.f32.gmra.mxu2 %v2121_v41 }
  0xbb   : > { %919 = vmatmul.f32.gmra.mxu3 %v2121_v41 }
  0xbe   : > { %1137 = vperm.xlu2 %1722, %v1116_v23  }
  0xc0   : > { %842 = vmatmul.f32.gmra.mxu0 %v2079_v20  ;;  %903 = vmatmul.f32.gmra.mxu1 %v2066_v63 }
  0xc2   : > { %858 = vmatmul.f32.gmra.mxu2 %v2137_v51 }
  0xc3   : > { %923 = vmatmul.f32.gmra.mxu3 %v2137_v51 }
  0xc8   : > { %907 = vmatmul.f32.gmra.mxu1 %v2079_v20 }
  0xe1   : > { %v2236_v46 = vpop.permute.xlu1 %951 }
  0xe5   : > { %v407_v43 = vpop.f32.mrf.mxu0 }
  0xed   : > { %v415_v55 = vpop.f32.mrf.mxu0  ;;  %v564_v57 = vpop.f32.mrf.mxu1 }
  0xee   : > { %v720_v48 = vpop.f32.mrf.mxu3  ;;  %v646_v59 = vpop.f32.mrf.mxu2  ;;  %v565_v11 = vadd.f32 %v564_v57, %v407_v43 }
  0xef   : > { %v942_v35 = vpop.permute.xlu0 %941 }
  0xf0   : > { %v647_v42 = vadd.f32 %v646_v59, %v565_v11  ;;  %v982_v62 = vadd.f32 %v2234_v50, %v942_v35 }
  0xf2   : > { %v721_v45 = vadd.f32 %v720_v48, %v647_v42 }
  0xf5   : > { %v423_v61 = vpop.f32.mrf.mxu0  ;;  %v568_v63 = vpop.f32.mrf.mxu1 }
  0xf6   : > { %v726_v60 = vpop.f32.mrf.mxu3  ;;  %v651_v0 = vpop.f32.mrf.mxu2  ;;  %v569_v28 = vadd.f32 %v568_v63, %v415_v55 }
  0xf8   : > { %v652_v52 = vadd.f32 %v651_v0, %v569_v28  ;;  %v962_v9 = vpop.permute.xlu2 %961 }
  0xf9   : > { %v986_v17 = vadd.f32 %v2234_v50, %v962_v9 }
  0xfa   : > { %v727_v23 = vadd.f32 %v726_v60, %v652_v52 }
  0xfd   : > { %v2210_v2 = vpop.f32.mrf.mxu0  ;;  %v572_v8 = vpop.f32.mrf.mxu1 }
  0xfe   : > { %v2208_v1 = vpop.f32.mrf.mxu3  ;;  %v656_v10 = vpop.f32.mrf.mxu2  ;;  %v573_v29 = vadd.f32 %v572_v8, %v423_v61 }
  0xff   : > { %v947_v54 = vpop.permute.xlu0 %946 }
 0x100   : > { %v657_v48 = vadd.f32 %v656_v10, %v573_v29  ;;  %v983_v60 = vadd.f32 %v2234_v50, %v947_v54 }
 0x105   : > { %v439_v16 = vpop.f32.mrf.mxu0  ;;  %v2214_v18 = vpop.f32.mrf.mxu1 }
 0x106   : > { %v2212_v12 = vpop.f32.mrf.mxu3  ;;  %v2216_v20 = vpop.f32.mrf.mxu2 }
 0x107   : > { %v972_v10 = vpop.permute.xlu0 %971 }
 0x10d   : > { %v447_v14 = vpop.f32.mrf.mxu0  ;;  %v580_v4 = vpop.f32.mrf.mxu1 }
 0x10e   : > { %v744_v21 = vpop.f32.mrf.mxu3  ;;  %v666_v24 = vpop.f32.mrf.mxu2  ;;  %v581_v15 = vadd.f32 %v580_v4, %v439_v16 }
 0x10f   : > { %v2267_v29 = vpop.permute.xlu0 %1122 }
 0x110   : > { %v667_v44 = vadd.f32 %v666_v24, %v581_v15 }
 0x112   : > { %v745_v34 = vadd.f32 %v744_v21, %v667_v44 }
 0x115   : > { %v455_v19 = vpop.f32.mrf.mxu0  ;;  %v584_v5 = vpop.f32.mrf.mxu1 }
 0x116   : > { %v750_v25 = vpop.f32.mrf.mxu3  ;;  %v671_v30 = vpop.f32.mrf.mxu2  ;;  %v585_v56 = vadd.f32 %v584_v5, %v447_v14 }
 0x117   : > { %v957_v14 = vpop.permute.xlu1 %956 }
 0x118   : > { %v672_v39 = vadd.f32 %v671_v30, %v585_v56  ;;  %v733_v30 = vadd.f32 %v2208_v1, %v657_v48  ;;  %v985_v48 = vadd.f32 %v2234_v50, %v957_v14 }
 0x11a   : > { %v751_v57 = vadd.f32 %v750_v25, %v672_v39 }
 0x11d   : > { %v2225_v26 = vpop.f32.mrf.mxu0  ;;  %v588_v31 = vpop.f32.mrf.mxu1 }
 0x11e   : > { %v2223_v6 = vpop.f32.mrf.mxu3  ;;  %v676_v32 = vpop.f32.mrf.mxu2  ;;  %v589_v59 = vadd.f32 %v588_v31, %v455_v19  ;;  %v577_v31 = vadd.f32 %v2214_v18, %v2210_v2 }
 0x11f   : > { %v967_v19 = vpop.permute.xlu2 %966 }
 0x120   : > { %v677_v25 = vadd.f32 %v676_v32, %v589_v59  ;;  %v987_v11 = vadd.f32 %v2234_v50, %v967_v19 }
 0x122   : > { %v757_v28 = vadd.f32 %v2223_v6, %v677_v25 }
 0x125   : > { %v592_v36 = vpop.f32.mrf.mxu1  ;;  %v831_v41 = vpop.f32.mrf.mxu0 }
 0x126   : > { %v2227_v38 = vpop.f32.mrf.mxu3  ;;  %v2229_v22 = vpop.f32.mrf.mxu2  ;;  %v832_v47 = vadd.f32 %v831_v41, %v721_v45 }
 0x12d   : > { %v835_v53 = vpop.f32.mrf.mxu0  ;;  %v896_v40 = vpop.f32.mrf.mxu1 }
 0x12e   : > { %v912_v51 = vpop.f32.mrf.mxu3  ;;  %v847_v49 = vpop.f32.mrf.mxu2  ;;  %v897_v7 = vadd.f32 %v896_v40, %v832_v47  ;;  %v836_v63 = vadd.f32 %v835_v53, %v727_v23  ;;  %v593_v47 = vadd.f32 %v592_v36, %v2225_v26 }
 0x12f   : > { %v848_v58 = vadd.f32 %v847_v49, %v745_v34  ;;  %v2257_v49 = vpop.permute.xlu1 %976 }
 0x130   : > { %v990_v3 = vmul.f32 2.0, %v897_v7  ;;  %v682_v26 = vadd.f32 %v2229_v22, %v593_v47  ;;  %v2273_v22 = vld [vmem:[%s2551_s3] ss:$0 sm:$0xff] }
 0x131   : > { %v913_v27 = vadd.f32 %v912_v51, %v848_v58  ;;  %v662_v51 = vadd.f32 %v2216_v20, %v577_v31  ;;  %v984_v58 = vadd.f32 %v2234_v50, %v2236_v46  ;;  %vm1144_vm6 = vcmp.eq.s32.totalorder %v2267_v29, %v2273_v22 }
 0x132   : > { %v998_v37 = vsub.f32 %v982_v62, %v990_v3 }
 0x133   : > { %v994_v43 = vmul.f32 2.0, %v913_v27  ;;  %v739_v9 = vadd.f32 %v2212_v12, %v662_v51  ;;  %v2306_v51 = vpop.permute.xlu0 %1131 }
 0x134   : > { %v2240_v55 = vmax.f32 %v998_v37, 0.0  ;;  %v2276_v37 = vpop.permute.xlu2 %1119  ;;  %vm1147_vm5 = vcmp.eq.s32.totalorder %v2306_v51, %v2273_v22 }
 0x135   : > { %v1002_v16 = vsub.f32 %v986_v17, %v994_v43  ;;  %v900_v21 = vpop.f32.mrf.mxu1  ;;  %v839_v4 = vpop.f32.mrf.mxu0  ;;  %v988_v17 = vadd.f32 %v2234_v50, %v972_v10  ;;  %vm1143_vm0 = vcmp.eq.s32.totalorder %v2276_v37, %v2273_v22 }
 0x136   : > { %v916_v0 = vpop.f32.mrf.mxu3  ;;  %1725 = vrsqrt.f32 %v2240_v55  ;;  %v851_v61 = vpop.f32.mrf.mxu2  ;;  %v901_v5 = vadd.f32 %v900_v21, %v836_v63  ;;  %v840_v42 = vadd.f32 %v839_v4, %v733_v30  ;;  %vm1021_vm1 = vcmp.eq.f32.partialorder %v2240_v55, inf  ;;  %v1151_v30 = vld [vmem:[#allocation2 + $0x30] sm:$0xff] }
 0x137   : > { %v2243_v8 = vmax.f32 %v1002_v16, 0.0  ;;  %v852_v24 = vadd.f32 %v851_v61, %v751_v57  ;;  %v763_v57 = vadd.f32 %v2227_v38, %v682_v26  ;;  %vm1023_vm2 = vcmp.eq.f32.partialorder %v2240_v55, 0.0 }
 0x138   : > { %v991_v35 = vmul.f32 2.0, %v901_v5  ;;  %v1024_v14 = vand.u32 2147483648, %v2240_v55 }
 0x139   : > { %1727 = vrsqrt.f32 %v2243_v8  ;;  %v917_v15 = vadd.f32 %v916_v0, %v852_v24  ;;  %vm1069_vm3 = vcmp.eq.f32.partialorder %v2243_v8, inf  ;;  %vm1071_vm4 = vcmp.eq.f32.partialorder %v2243_v8, 0.0 }
 0x13a   : > { %v999_v44 = vsub.f32 %v983_v60, %v991_v35 }
 0x13b   : > { %v995_v45 = vmul.f32 2.0, %v917_v15  ;;  %v2296_v15 = vpop.permute.xlu1 %1125 }
 0x13c   : > { %v1726_v41 = vpop.eup %1725  ;;  %v2255_v34 = vmax.f32 %v999_v44, 0.0  ;;  %vm1145_vm14 = vcmp.eq.s32.totalorder %v2296_v15, %v2273_v22 }
 0x13d   : > { %v1015_v1 = vmul.f32 %v1726_v41, %v2240_v55  ;;  %v904_v32 = vpop.f32.mrf.mxu1  ;;  %v1003_v2 = vsub.f32 %v987_v11, %v995_v45  ;;  %v843_v20 = vpop.f32.mrf.mxu0 }
 0x13e   : > { %v855_v18 = vpop.f32.mrf.mxu2  ;;  %v905_v56 = vadd.f32 %v904_v32, %v840_v42  ;;  %v920_v54 = vpop.f32.mrf.mxu3  ;;  %1729 = vrsqrt.f32 %v2255_v34  ;;  %v844_v23 = vadd.f32 %v843_v20, %v739_v9  ;;  %v1155_v32 = vld [vmem:[#allocation2 + $0x8] sm:$0xff]  ;;  %v989_v9 = vadd.f32 %v2234_v50, %v2257_v49 }
 0x13f   : > { %v1728_v53 = vpop.eup %1727  ;;  %v1016_v40 = vmul.f32 %v1726_v41, %v1015_v1  ;;  %v856_v62 = vadd.f32 %v855_v18, %v757_v28  ;;  %v2262_v7 = vmax.f32 %v1003_v2, 0.0  ;;  %vm1033_vm7 = vcmp.eq.f32.partialorder %v2255_v34, inf }
 0x140   : > { %v1063_v6 = vmul.f32 %v1728_v53, %v2243_v8  ;;  %v992_v52 = vmul.f32 2.0, %v905_v56  ;;  %vm1035_vm8 = vcmp.eq.f32.partialorder %v2255_v34, 0.0 }
 0x141   : > { %v1017_v36 = vmul.f32 0.5, %v1016_v40  ;;  %v921_v39 = vadd.f32 %v920_v54, %v856_v62  ;;  %1731 = vrsqrt.f32 %v2262_v7  ;;  %vm1081_vm9 = vcmp.eq.f32.partialorder %v2262_v7, inf }
 0x142   : > { %v1064_v3 = vmul.f32 %v1728_v53, %v1063_v6  ;;  %v1000_v43 = vsub.f32 %v984_v58, %v992_v52  ;;  %vm1083_vm10 = vcmp.eq.f32.partialorder %v2262_v7, 0.0 }
 0x143   : > { %v1018_v27 = vsub.f32 1.5, %v1017_v36  ;;  %v996_v46 = vmul.f32 2.0, %v921_v39 }
 0x144   : > { %v1065_v12 = vmul.f32 0.5, %v1064_v3  ;;  %v1730_v16 = vpop.eup %1729  ;;  %v2282_v0 = vmax.f32 %v1000_v43, 0.0 }
 0x145   : > { %v1019_v59 = vmul.f32 %v1726_v41, %v1018_v27  ;;  %v908_v63 = vpop.f32.mrf.mxu1  ;;  %v1004_v61 = vsub.f32 %v988_v17, %v996_v46  ;;  %v1027_v38 = vmul.f32 %v1730_v16, %v2255_v34  ;;  %v1152_v46 = vld [vmem:[#allocation2] sm:$0xff] }
 0x146   : > { %v1066_v21 = vsub.f32 1.5, %v1065_v12  ;;  %v859_v4 = vpop.f32.mrf.mxu2  ;;  %v909_v24 = vadd.f32 %v908_v63, %v844_v23  ;;  %1733 = vrsqrt.f32 %v2282_v0  ;;  %v924_v47 = vpop.f32.mrf.mxu3  ;;  %v1036_v12 = vand.u32 2147483648, %v2255_v34 }
 0x147   : > { %v1020_v5 = vmul.f32 %v1019_v59, %v2240_v55  ;;  %v1732_v10 = vpop.eup %1731  ;;  %v1028_v19 = vmul.f32 %v1730_v16, %v1027_v38  ;;  %v2292_v31 = vmax.f32 %v1004_v61, 0.0  ;;  %v860_v11 = vadd.f32 %v859_v4, %v763_v57  ;;  %v2331_v23 = vpop.permute.xlu2 %1128  ;;  %v1156_v38 = vld [vmem:[#allocation2 + $0x20] sm:$0xff] }
 0x148   : > { %v1067_v60 = vmul.f32 %v1728_v53, %v1066_v21  ;;  %v1075_v42 = vmul.f32 %v1732_v10, %v2262_v7  ;;  %v993_v44 = vmul.f32 2.0, %v909_v24  ;;  %v2338_v63 = vpop.permute.xlu1 %1134  ;;  %v1084_v4 = vand.u32 2147483648, %v2262_v7 }
 0x149   : > { %v1022_v25 = vsel %vm1021_vm1, %v2240_v55, %v1020_v5  ;;  %v1072_v55 = vand.u32 2147483648, %v2243_v8  ;;  %v1029_v28 = vmul.f32 0.5, %v1028_v19  ;;  %1735 = vrsqrt.f32 %v2292_v31 }
 0x14a   : > { %v2294_v35 = vsel %vm1023_vm2, %v1024_v14, %v1022_v25  ;;  %v1068_v41 = vmul.f32 %v1067_v60, %v2243_v8  ;;  %v1076_v18 = vmul.f32 %v1732_v10, %v1075_v42  ;;  %v1001_v40 = vsub.f32 %v985_v48, %v993_v44 }
 0x14b   : > { %v1159_v45 = vsel %vm1143_vm0, %v2294_v35, 0.0  ;;  %v1030_v53 = vsub.f32 1.5, %v1029_v28  ;;  %v925_v26 = vadd.f32 %v924_v47, %v860_v11  ;;  %vm1148_vm11 = vcmp.eq.s32.totalorder %v2338_v63, %v2273_v22  ;;  %v1153_v47 = vld [vmem:[#allocation2 + $0x18] sm:$0xff] }
 0x14c   : > { %v1167_v1 = vadd.f32 %v1159_v45, %v1151_v30  ;;  %v1070_v2 = vsel %vm1069_vm3, %v2243_v8, %v1068_v41  ;;  %v1734_v62 = vpop.eup %1733  ;;  %v1077_v6 = vmul.f32 0.5, %v1076_v18  ;;  %v2321_v52 = vmax.f32 %v1001_v40, 0.0 }
 0x14d   : > { %v2312_v56 = vsel %vm1071_vm4, %v1072_v55, %v1070_v2  ;;  %v1031_v20 = vmul.f32 %v1730_v16, %v1030_v53  ;;  %v1039_v8 = vmul.f32 %v1734_v62, %v2282_v0  ;;  %v997_v3 = vmul.f32 2.0, %v925_v26 }
 0x14e   : > { %1175 = vst [vmem:[#allocation2 + $0x30] sm:$0xff] %v1167_v1  ;;  %v1163_v54 = vsel %vm1147_vm5, %v2312_v56, 0.0  ;;  %v1078_v58 = vsub.f32 1.5, %v1077_v6  ;;  %1737 = vrsqrt.f32 %v2321_v52  ;;  %vm1045_vm12 = vcmp.eq.f32.partialorder %v2282_v0, inf }
 0x14f   : > { %v1171_v36 = vadd.f32 %v1163_v54, %v1155_v32  ;;  %v1736_v39 = vpop.eup %1735  ;;  %v1032_v17 = vmul.f32 %v1031_v20, %v2255_v34  ;;  %v1040_v27 = vmul.f32 %v1734_v62, %v1039_v8  ;;  %v1005_v57 = vsub.f32 %v989_v9, %v997_v3  ;;  %v2370_v32 = vpop.permute.xlu2 %1137  ;;  %v1157_v54 = vld [vmem:[#allocation2 + $0x28] sm:$0xff] }
 0x150   : > { %v1079_v43 = vmul.f32 %v1732_v10, %v1078_v58  ;;  %v1087_v50 = vmul.f32 %v1736_v39, %v2292_v31  ;;  %v1048_v44 = vand.u32 2147483648, %v2282_v0  ;;  %vm1047_vm13 = vcmp.eq.f32.partialorder %v2282_v0, 0.0 }
 0x151   : > { %1179 = vst [vmem:[#allocation2 + $0x8] sm:$0xff] %v1171_v36  ;;  %v1034_v49 = vsel %vm1033_vm7, %v2255_v34, %v1032_v17  ;;  %v1041_v48 = vmul.f32 0.5, %v1040_v27  ;;  %v2347_v24 = vmax.f32 %v1005_v57, 0.0  ;;  %vm1093_vm15 = vcmp.eq.f32.partialorder %v2292_v31, inf  ;;  %v2403_v57 = vpop.permute.xlu0 %1140 }
 0x152   : > { %v2336_v59 = vsel %vm1035_vm8, %v1036_v12, %v1034_v49  ;;  %v1080_v16 = vmul.f32 %v1079_v43, %v2262_v7  ;;  %v1088_v21 = vmul.f32 %v1736_v39, %v1087_v50  ;;  %vm1095_vm1 = vcmp.eq.f32.partialorder %v2292_v31, 0.0  ;;  %v1154_v12 = vld [vmem:[#allocation2 + $0x10] sm:$0xff] }
 0x153   : > { %v1160_v61 = vsel %vm1144_vm6, %v2336_v59, 0.0  ;;  %v1042_v34 = vsub.f32 1.5, %v1041_v48  ;;  %1739 = vrsqrt.f32 %v2347_v24  ;;  %vm1149_vm2 = vcmp.eq.s32.totalorder %v2370_v32, %v2273_v22 }
 0x154   : > { %v1168_v5 = vadd.f32 %v1160_v61, %v1152_v46  ;;  %v1082_v14 = vsel %vm1081_vm9, %v2262_v7, %v1080_v16  ;;  %v1089_v60 = vmul.f32 0.5, %v1088_v21  ;;  %v1738_v10 = vpop.eup %1737  ;;  %vm1057_vm3 = vcmp.eq.f32.partialorder %v2321_v52, inf  ;;  %v1158_v61 = vld [vmem:[#allocation2 + $0x38] sm:$0xff] }
 0x155   : > { %v2351_v30 = vsel %vm1083_vm10, %v1084_v4, %v1082_v14  ;;  %v1043_v25 = vmul.f32 %v1734_v62, %v1042_v34  ;;  %v1051_v41 = vmul.f32 %v1738_v10, %v2321_v52  ;;  %v1060_v17 = vand.u32 2147483648, %v2321_v52 }
 0x156   : > { %1176 = vst [vmem:[#allocation2] sm:$0xff] %v1168_v5  ;;  %v1164_v19 = vsel %vm1148_vm11, %v2351_v30, 0.0  ;;  %v1090_v11 = vsub.f32 1.5, %v1089_v60  ;;  %vm1059_vm4 = vcmp.eq.f32.partialorder %v2321_v52, 0.0  ;;  %vm1146_vm7 = vcmp.eq.s32.totalorder %v2331_v23, %v2273_v22 }
 0x157   : > { %v1172_v7 = vadd.f32 %v1164_v19, %v1156_v38  ;;  %v1044_v42 = vmul.f32 %v1043_v25, %v2282_v0  ;;  %v1052_v55 = vmul.f32 %v1738_v10, %v1051_v41  ;;  %vm1105_vm8 = vcmp.eq.f32.partialorder %v2347_v24, inf }
 0x158   : > { %v1091_v45 = vmul.f32 %v1736_v39, %v1090_v11  ;;  %vm1107_vm9 = vcmp.eq.f32.partialorder %v2347_v24, 0.0  ;;  %vm1150_vm10 = vcmp.eq.s32.totalorder %v2403_v57, %v2273_v22 }
 0x159   : > { %1180 = vst [vmem:[#allocation2 + $0x20] sm:$0xff] %v1172_v7  ;;  %v1046_v28 = vsel %vm1045_vm12, %v2282_v0, %v1044_v42  ;;  %v1053_v18 = vmul.f32 0.5, %v1052_v55  ;;  %v1740_v53 = vpop.eup %1739  ;;  %v1096_v0 = vand.u32 2147483648, %v2292_v31 }
 0x15a   : > { %v2368_v1 = vsel %vm1047_vm13, %v1048_v44, %v1046_v28  ;;  %v1092_v2 = vmul.f32 %v1091_v45, %v2292_v31  ;;  %v1099_v36 = vmul.f32 %v1740_v53, %v2347_v24 }
 0x15b   : > { %v1161_v40 = vsel %vm1145_vm14, %v2368_v1, 0.0  ;;  %v1054_v26 = vsub.f32 1.5, %v1053_v18 }
 0x15c   : > { %v1169_v62 = vadd.f32 %v1161_v40, %v1153_v47  ;;  %v1094_v6 = vsel %vm1093_vm15, %v2292_v31, %v1092_v2  ;;  %v1100_v58 = vmul.f32 %v1740_v53, %v1099_v36 }
 0x15d   : > { %v2382_v20 = vsel %vm1095_vm1, %v1096_v0, %v1094_v6  ;;  %v1055_v9 = vmul.f32 %v1738_v10, %v1054_v26 }
 0x15e   : > { %1177 = vst [vmem:[#allocation2 + $0x18] sm:$0xff] %v1169_v62  ;;  %v1165_v8 = vsel %vm1149_vm2, %v2382_v20, 0.0  ;;  %v1101_v31 = vmul.f32 0.5, %v1100_v58 }
 0x15f   : > { %v1173_v3 = vadd.f32 %v1165_v8, %v1157_v54  ;;  %v1056_v39 = vmul.f32 %v1055_v9, %v2321_v52 }
 0x160   : > { %v1102_v43 = vsub.f32 1.5, %v1101_v31 }
 0x161   : > { %1181 = vst [vmem:[#allocation2 + $0x28] sm:$0xff] %v1173_v3  ;;  %v1058_v27 = vsel %vm1057_vm3, %v2321_v52, %v1056_v39  ;;  %v1108_v52 = vand.u32 2147483648, %v2347_v24 }
 0x162   : > { %v2397_v50 = vsel %vm1059_vm4, %v1060_v17, %v1058_v27  ;;  %v1103_v46 = vmul.f32 %v1740_v53, %v1102_v43 }
 0x163   : > { %v1162_v49 = vsel %vm1146_vm7, %v2397_v50, 0.0 }
 0x164   : > { %v1170_v48 = vadd.f32 %v1162_v49, %v1154_v12  ;;  %v1104_v16 = vmul.f32 %v1103_v46, %v2347_v24 }
 0x166   : > { %1178 = vst [vmem:[#allocation2 + $0x10] sm:$0xff] %v1170_v48  ;;  %v1106_v21 = vsel %vm1105_vm8, %v2347_v24, %v1104_v16 }
 0x167   : > { %v2412_v4 = vsel %vm1107_vm9, %v1108_v52, %v1106_v21  ;;  %1193 = sbr.rel (%p2204_p10) target bundleno = 384 (0x180), region = 56 }
 0x168   : > { %v1166_v34 = vsel %vm1150_vm10, %v2412_v4, 0.0 }
 0x169   : > { %v1174_v5 = vadd.f32 %v1166_v34, %v1158_v61 }
 0x16b   : > { %1182 = vst [vmem:[#allocation2 + $0x38] sm:$0xff] %v1174_v5 }
 0x16c   : > { %v1194_v38 = vlaneseq  ;;  %v1203_v14 = vstv %s2200_s8  ;;  %v1232_v45 = vld [vmem:[#allocation2 + $0x30] sm:$0xff]  ;;  %v1233_v62 = vld [vmem:[#allocation2] sm:$0xff]  ;;  %v1234_v6 = vld [vmem:[#allocation2 + $0x18] sm:$0xff] }
 0x16d   : > { %v1235_v26 = vld [vmem:[#allocation2 + $0x10] sm:$0xff]  ;;  %v1236_v29 = vld [vmem:[#allocation2 + $0x8] sm:$0xff]  ;;  %v1237_v15 = vld [vmem:[#allocation2 + $0x20] sm:$0xff] }
 0x16e   : > { %v1195_v24 = vshrl.u32 %v1194_v38, 7  ;;  %v1213_v60 = vand.u32 127, %v1194_v38  ;;  %v1238_v23 = vld [vmem:[#allocation2 + $0x28] sm:$0xff] }
 0x170   : > { %v1204_v10 = vadd.s32 %v1203_v14, %v1195_v24  ;;  %v1196_v25 = vadd.s32 8, %v1195_v24  ;;  %v1197_v19 = vadd.s32 16, %v1195_v24  ;;  %v1198_v11 = vadd.s32 24, %v1195_v24 }
 0x171   : > { %v1199_v41 = vadd.s32 32, %v1195_v24  ;;  %v1200_v7 = vadd.s32 40, %v1195_v24  ;;  %v1201_v42 = vadd.s32 48, %v1195_v24  ;;  %v1202_v44 = vadd.s32 56, %v1195_v24 }
 0x172   : > { %vm1216_vm12 = vcmp.eq.s32.totalorder %v1204_v10, %v1213_v60  ;;  %v1205_v55 = vadd.s32 %v1203_v14, %v1196_v25  ;;  %v1206_v28 = vadd.s32 %v1203_v14, %v1197_v19  ;;  %v1207_v47 = vadd.s32 %v1203_v14, %v1198_v11  ;;  %v1239_v51 = vld [vmem:[#allocation2 + $0x38] sm:$0xff] }
 0x173   : > { %vm1224_vm13 = vmand %vm1143_vm0, %vm1216_vm12  ;;  %v1208_v2 = vadd.s32 %v1203_v14, %v1199_v41  ;;  %v1209_v18 = vadd.s32 %v1203_v14, %v1200_v7  ;;  %v1210_v53 = vadd.s32 %v1203_v14, %v1201_v42  ;;  %v1211_v40 = vadd.s32 %v1203_v14, %v1202_v44 }
 0x174   : > { %v1240_v0 = vsel %vm1224_vm13, %v2294_v35, 0.0  ;;  %vm1217_vm15 = vcmp.eq.s32.totalorder %v1205_v55, %v1213_v60  ;;  %vm1218_vm1 = vcmp.eq.s32.totalorder %v1206_v28, %v1213_v60  ;;  %vm1219_vm3 = vcmp.eq.s32.totalorder %v1207_v47, %v1213_v60 }
 0x175   : > { %v1248_v54 = vsub.f32 %v1232_v45, %v1240_v0  ;;  %vm1225_vm4 = vmand %vm1144_vm6, %vm1217_vm15  ;;  %vm1220_vm8 = vcmp.eq.s32.totalorder %v1208_v2, %v1213_v60  ;;  %vm1221_vm9 = vcmp.eq.s32.totalorder %v1209_v18, %v1213_v60  ;;  %vm1222_vm6 = vcmp.eq.s32.totalorder %v1210_v53, %v1213_v60 }
 0x176   : > { %v1241_v37 = vsel %vm1225_vm4, %v2336_v59, 0.0  ;;  %vm1226_vm0 = vmand %vm1145_vm14, %vm1218_vm1  ;;  %vm1223_vm14 = vcmp.eq.s32.totalorder %v1211_v40, %v1213_v60 }
 0x177   : > { %1256 = vst [vmem:[#allocation2 + $0x30] sm:$0xff] %v1248_v54  ;;  %v1249_v36 = vsub.f32 %v1233_v62, %v1241_v37  ;;  %v1242_v8 = vsel %vm1226_vm0, %v2368_v1, 0.0  ;;  %vm1227_vm12 = vmand %vm1146_vm7, %vm1219_vm3 }
 0x178   : > { %v1250_v9 = vsub.f32 %v1234_v6, %v1242_v8  ;;  %v1243_v58 = vsel %vm1227_vm12, %v2397_v50, 0.0  ;;  %vm1228_vm13 = vmand %vm1147_vm5, %vm1220_vm8 }
 0x179   : > { %1257 = vst [vmem:[#allocation2] sm:$0xff] %v1249_v36  ;;  %v1251_v3 = vsub.f32 %v1235_v26, %v1243_v58  ;;  %v1244_v39 = vsel %vm1228_vm13, %v2312_v56, 0.0  ;;  %vm1229_vm7 = vmand %vm1148_vm11, %vm1221_vm9 }
 0x17a   : > { %1258 = vst [vmem:[#allocation2 + $0x18] sm:$0xff] %v1250_v9  ;;  %v1252_v31 = vsub.f32 %v1236_v29, %v1244_v39  ;;  %v1245_v17 = vsel %vm1229_vm7, %v2351_v30, 0.0  ;;  %vm1230_vm5 = vmand %vm1149_vm2, %vm1222_vm6 }
 0x17b   : > { %1259 = vst [vmem:[#allocation2 + $0x10] sm:$0xff] %v1251_v3  ;;  %v1253_v27 = vsub.f32 %v1237_v15, %v1245_v17  ;;  %v1246_v12 = vsel %vm1230_vm5, %v2382_v20, 0.0  ;;  %vm1231_vm15 = vmand %vm1150_vm10, %vm1223_vm14 }
 0x17c   : > { %1260 = vst [vmem:[#allocation2 + $0x8] sm:$0xff] %v1252_v31  ;;  %v1254_v63 = vsub.f32 %v1238_v23, %v1246_v12  ;;  %v1247_v43 = vsel %vm1231_vm15, %v2412_v4, 0.0 }
 0x17d   : > { %1261 = vst [vmem:[#allocation2 + $0x20] sm:$0xff] %v1253_v27  ;;  %v1255_v49 = vsub.f32 %v1239_v51, %v1247_v43 }
 0x17e   : > { %1262 = vst [vmem:[#allocation2 + $0x28] sm:$0xff] %v1254_v63 }
 0x17f   : > { %1263 = vst [vmem:[#allocation2 + $0x38] sm:$0xff] %v1255_v49 }
 0x180 PF: > { %1742 = vset.pattern.permute.xlu1 %v1788_v33  ;;  %1741 = vset.pattern.permute.xlu0 %v1788_v33  ;;  %v1266_v32 = vld [vmem:[%s1869_s11 + $0x10] sm:$0xff]  ;;  %v1264_v46 = vld [vmem:[%s1869_s11] sm:$0xff]  ;;  %v1267_v57 = vld [vmem:[%s1869_s11 + $0x18] sm:$0xff]  ;;  %vm1304_vm11 = vcmp.ne.s32.totalorder %v2221_v13, 2147483648 }
 0x181   : > { %1279 = vperm.xlu1 %1742, %v1266_v32   ;;  %1273 = vperm.xlu0 %1741, %v1264_v46   ;;  %v1268_v48 = vld [vmem:[%s1869_s11 + $0x20] sm:$0xff]  ;;  %v1265_v16 = vld [vmem:[%s1869_s11 + $0x8] sm:$0xff]  ;;  %v1271_v21 = vld [vmem:[%s1869_s11 + $0x38] sm:$0xff]  ;;  %v1305_v34 = vsel %vm1304_vm11, 1, %v1788_v33 }
 0x182   : > { %1743 = vset.pattern.permute.xlu2 %v1788_v33  ;;  %v1269_v52 = vld [vmem:[%s1869_s11 + $0x28] sm:$0xff]  ;;  %v1270_v61 = vld [vmem:[%s1869_s11 + $0x30] sm:$0xff]  ;;  %v1306_v5 = vperm.slane %v1305_v34, 0 }
 0x183   : > { %1285 = vperm.xlu2 %1743, %v1268_v48  }
 0x184   : > { %vm2467_vm2 = vcmp.eq.s32.totalorder %v1306_v5, 1 }
 0x189   : > { %1282 = vperm.xlu1 %1742, %v1267_v57   ;;  %1276 = vperm.xlu0 %1741, %v1265_v16  }
 0x18b   : > { %1288 = vperm.xlu2 %1743, %v1269_v52  }
 0x191   : > { %1294 = vperm.xlu1 %1742, %v1271_v21   ;;  %1291 = vperm.xlu0 %1741, %v1270_v61  }
 0x1dd   : > { %v1286_v38 = vpop.permute.xlu2 %1285 }
 0x1de   : > { %vm1300_vm10 = vcmp.ne.s32.totalorder %v1286_v38, %v2273_v22 }
 0x1df   : > { %vm1312_vm1 = vmand %vm1300_vm10, %vm2467_vm2 }
 0x1e0   : > { %v1320_v24 = vsel %vm1312_vm1, %v2312_v56, inf }
 0x1e1   : > { %1330 = vst [vmem:[#allocation5 + $0x8] sm:$0xff] %v1320_v24 }
 0x1e5   : > { %v1289_v60 = vpop.permute.xlu2 %1288 }
 0x1e6   : > { %vm1301_vm3 = vcmp.ne.s32.totalorder %v1289_v60, %v2273_v22 }
 0x1e7   : > { %vm1313_vm4 = vmand %vm1301_vm3, %vm2467_vm2 }
 0x1e8   : > { %v1321_v33 = vsel %vm1313_vm4, %v2351_v30, inf }
 0x1e9   : > { %1331 = vst [vmem:[#allocation5 + $0x30] sm:$0xff] %v1321_v33 }
 0x1f3   : > { %v1280_v13 = vpop.permute.xlu1 %1279  ;;  %v1274_v10 = vpop.permute.xlu0 %1273 }
 0x1f4   : > { %vm1298_vm8 = vcmp.ne.s32.totalorder %v1280_v13, %v2273_v22  ;;  %vm1296_vm0 = vcmp.ne.s32.totalorder %v1274_v10, %v2273_v22 }
 0x1f5   : > { %vm1310_vm9 = vmand %vm1298_vm8, %vm2467_vm2 }
 0x1f6   : > { %v1318_v56 = vsel %vm1310_vm9, %v2368_v1, inf  ;;  %vm1308_vm12 = vmand %vm1296_vm0, %vm2467_vm2 }
 0x1f7   : > { %1328 = vst [vmem:[#allocation5 + $0x38] sm:$0xff] %v1318_v56  ;;  %v1316_v25 = vsel %vm1308_vm12, %v2294_v35, inf }
 0x1f8   : > { %1326 = vst [vmem:[#allocation5 + $0x28] sm:$0xff] %v1316_v25 }
 0x1fb   : > { %v1283_v30 = vpop.permute.xlu1 %1282  ;;  %v1277_v19 = vpop.permute.xlu0 %1276 }
 0x1fc   : > { %vm1299_vm6 = vcmp.ne.s32.totalorder %v1283_v30, %v2273_v22  ;;  %vm1297_vm13 = vcmp.ne.s32.totalorder %v1277_v19, %v2273_v22 }
 0x1fd   : > { %vm1311_vm14 = vmand %vm1299_vm6, %vm2467_vm2 }
 0x1fe   : > { %v1319_v11 = vsel %vm1311_vm14, %v2397_v50, inf  ;;  %vm1309_vm7 = vmand %vm1297_vm13, %vm2467_vm2 }
 0x1ff   : > { %1329 = vst [vmem:[#allocation5 + $0x10] sm:$0xff] %v1319_v11  ;;  %v1317_v1 = vsel %vm1309_vm7, %v2336_v59, inf }
 0x200   : > { %1327 = vst [vmem:[#allocation5 + $0x20] sm:$0xff] %v1317_v1 }
 0x203   : > { %v1295_v35 = vpop.permute.xlu1 %1294  ;;  %v1292_v41 = vpop.permute.xlu0 %1291 }
 0x204   : > { %vm1303_vm5 = vcmp.ne.s32.totalorder %v1295_v35, %v2273_v22  ;;  %vm1302_vm15 = vcmp.ne.s32.totalorder %v1292_v41, %v2273_v22 }
 0x205   : > { %vm1315_vm11 = vmand %vm1303_vm5, %vm2467_vm2 }
 0x206   : > { %v1323_v7 = vsel %vm1315_vm11, %v2412_v4, inf  ;;  %vm1314_vm10 = vmand %vm1302_vm15, %vm2467_vm2 }
 0x207   : > { %1333 = vst [vmem:[#allocation5] sm:$0xff] %v1323_v7  ;;  %v1322_v50 = vsel %vm1314_vm10, %v2382_v20, inf }
 0x208   : > { %1332 = vst [vmem:[#allocation5 + $0x18] sm:$0xff] %v1322_v50 }
 0x209 PF: > { %1335 = sbr.rel (!%p318_p5) target bundleno = 656 (0x290), region = 60  ;;  %v1338_v59 = vld [vmem:[#allocation2 + $0x18] sm:$0xff] (%p318_p5)  ;;  %v1336_v42 = vld [vmem:[#allocation2 + $0x30] sm:$0xff] (%p318_p5)  ;;  %v1340_v44 = vld [vmem:[#allocation2 + $0x8] sm:$0xff] (%p318_p5)  ;;  %vm1360_vm2 = vcmask (%p318_p5), 7168  }
 0x20a   : > { %1348 = vadd.xlane.f32.xlu1 (%p318_p5), %v1338_v59  ;;  %1344 = vadd.xlane.f32.xlu0 (%p318_p5), %v1336_v42  ;;  %v1339_v22 = vld [vmem:[#allocation2 + $0x10] sm:$0xff] (%p318_p5)  ;;  %v1337_v45 = vld [vmem:[#allocation2] sm:$0xff] (%p318_p5)  ;;  %v1343_v55 = vld [vmem:[#allocation2 + $0x38] sm:$0xff] (%p318_p5) }
 0x20b   : > { %1352 = vadd.xlane.f32.xlu2 (%p318_p5), %v1340_v44  ;;  %v1341_v4 = vld [vmem:[#allocation2 + $0x20] sm:$0xff] (%p318_p5)  ;;  %v1342_v28 = vld [vmem:[#allocation2 + $0x28] sm:$0xff] (%p318_p5) }
 0x212   : > { %1350 = vadd.xlane.f32.xlu1 %v1339_v22  ;;  %1346 = vadd.xlane.f32.xlu0 %v1337_v45 }
 0x213   : > { %1354 = vadd.xlane.f32.xlu2 %v1341_v4 }
 0x21a   : > { %1358 = vadd.xlane.f32.xlu1 %v1343_v55  ;;  %1356 = vadd.xlane.f32.xlu0 %v1342_v28 }
 0x27d   : > { %v1349_v20 = vpop.xlane.xlu1 %1348  ;;  %v1345_v47 = vpop.xlane.xlu0 %1344 }
 0x27e   : > { %1363 = vst.msk [vmem:[#allocation4 + $0x10] sm:$0xff] %vm1360_vm2, %v1349_v20  ;;  %v1353_v2 = vpop.xlane.xlu2 %1352 }
 0x27f   : > { %1361 = vst.msk [vmem:[#allocation4] sm:$0xff] %vm1360_vm2, %v1345_v47 }
 0x280   : > { %1365 = vst.msk [vmem:[#allocation4 + $0x20] sm:$0xff] %vm1360_vm2, %v1353_v2 }
 0x285   : > { %v1351_v18 = vpop.xlane.xlu1 %1350  ;;  %v1347_v53 = vpop.xlane.xlu0 %1346 }
 0x286   : > { %1364 = vst.msk [vmem:[#allocation4 + $0x18] sm:$0xff] %vm1360_vm2, %v1351_v18  ;;  %v1355_v40 = vpop.xlane.xlu2 %1354 }
 0x287   : > { %1362 = vst.msk [vmem:[#allocation4 + $0x8] sm:$0xff] %vm1360_vm2, %v1347_v53 }
 0x288   : > { %1366 = vst.msk [vmem:[#allocation4 + $0x28] sm:$0xff] %vm1360_vm2, %v1355_v40 }
 0x28d   : > { %v1359_v0 = vpop.xlane.xlu1 %1358  ;;  %v1357_v62 = vpop.xlane.xlu0 %1356 }
 0x28e   : > { %1368 = vst.msk [vmem:[#allocation4 + $0x38] sm:$0xff] %vm1360_vm2, %v1359_v0 }
 0x28f   : > { %1367 = vst.msk [vmem:[#allocation4 + $0x30] sm:$0xff] %vm1360_vm2, %v1357_v62 }
 0x290 PF: > { %p1369_p11 = scmp.eq.s32.totalorder %s1769_s21, 1  ;;  %p1637_p12 = scmp.ne.s32.totalorder %s1769_s21, 1 }
 0x292   : > { %1372 = sbr.rel (%p1637_p12) target bundleno = 805 (0x325), region = 64 }
 0x297   : > { %v1375_v54 = vld [vmem:[#allocation4 + $0x10] sm:$0xff]  ;;  %v1373_v6 = vld [vmem:[#allocation4] sm:$0xff]  ;;  %v1789_v37 = vmov 0   ;;  %v1376_v9 = vld [vmem:[#allocation4 + $0x18] sm:$0xff] }
 0x298   : > { %1745 = vset.pattern.permute.xlu1 %v1789_v37  ;;  %1744 = vset.pattern.permute.xlu0 %v1789_v37  ;;  %v1383_v26 = vadd.f32 1.0, %v1375_v54  ;;  %v1381_v36 = vadd.f32 1.0, %v1373_v6  ;;  %v1377_v8 = vld [vmem:[#allocation4 + $0x20] sm:$0xff]  ;;  %v1374_v58 = vld [vmem:[#allocation4 + $0x8] sm:$0xff]  ;;  %v1384_v3 = vadd.f32 1.0, %v1376_v9  ;;  %v1380_v31 = vld [vmem:[#allocation4 + $0x38] sm:$0xff] }
 0x299   : > { %1746 = vset.pattern.permute.xlu2 %v1789_v37  ;;  %v1385_v29 = vadd.f32 1.0, %v1377_v8  ;;  %v1378_v15 = vld [vmem:[#allocation4 + $0x28] sm:$0xff]  ;;  %v1382_v39 = vadd.f32 1.0, %v1374_v58  ;;  %v1379_v17 = vld [vmem:[#allocation4 + $0x30] sm:$0xff]  ;;  %v1388_v51 = vadd.f32 1.0, %v1380_v31  ;;  %v1393_v34 = vld [vmem:[#allocation5 + $0x38] sm:$0xff] }
 0x29a   : > { %1411 = vperm.xlu1 %1745, %v1383_v26   ;;  %1401 = vperm.xlu0 %1744, %v1381_v36   ;;  %v1386_v23 = vadd.f32 1.0, %v1378_v15  ;;  %v1387_v27 = vadd.f32 1.0, %v1379_v17  ;;  %v1395_v12 = vld [vmem:[#allocation5 + $0x8] sm:$0xff]  ;;  %v1396_v48 = vld [vmem:[#allocation5 + $0x30] sm:$0xff]  ;;  %v1455_v13 = vld [vmem:[#allocation3] sm:$0xff] }
 0x29b   : > { %1421 = vperm.xlu2 %1746, %v1385_v29   ;;  %v1459_v49 = vld [vmem:[#allocation3 + $0x28] sm:$0xff]  ;;  %v1457_v33 = vld [vmem:[#allocation3 + $0x10] sm:$0xff]  ;;  %v1392_v11 = vld [vmem:[#allocation5 + $0x20] sm:$0xff] }
 0x29c   : > { %v1460_v52 = vld [vmem:[#allocation3 + $0x8] sm:$0xff]  ;;  %v1394_v19 = vld [vmem:[#allocation5 + $0x10] sm:$0xff]  ;;  %v1458_v50 = vld [vmem:[#allocation3 + $0x20] sm:$0xff] }
 0x29d   : > { %v1391_v5 = vld [vmem:[#allocation5 + $0x28] sm:$0xff]  ;;  %v1456_v59 = vld [vmem:[#allocation3 + $0x18] sm:$0xff]  ;;  %v1398_v4 = vld [vmem:[#allocation5] sm:$0xff] }
 0x29e   : > { %v1397_v55 = vld [vmem:[#allocation5 + $0x18] sm:$0xff]  ;;  %v1461_v53 = vld [vmem:[#allocation3 + $0x30] sm:$0xff] }
 0x29f   : > { %v1462_v18 = vld [vmem:[#allocation3 + $0x38] sm:$0xff] }
 0x2a2   : > { %1416 = vperm.xlu1 %1745, %v1384_v3   ;;  %1406 = vperm.xlu0 %1744, %v1382_v39  }
 0x2a3   : > { %1426 = vperm.xlu2 %1746, %v1386_v23  }
 0x2aa   : > { %1436 = vperm.xlu1 %1745, %v1388_v51   ;;  %1431 = vperm.xlu0 %1744, %v1387_v27  }
 0x2f5   : > { %v1422_v63 = vpop.permute.xlu2 %1421 }
 0x2f6   : > { %v1443_v43 = vsub.f32 %v1422_v63, %v1395_v12 }
 0x2f8   : > { %v1451_v32 = vmax.f32 %v1443_v43, 0.0 }
 0x2fa   : > { %v1467_v46 = vadd.f32 %v1459_v49, %v1451_v32 }
 0x2fc   : > { %1475 = vst [vmem:[#allocation3 + $0x28] sm:$0xff] %v1467_v46 }
 0x2fd   : > { %v1427_v57 = vpop.permute.xlu2 %1426 }
 0x2fe   : > { %v1444_v16 = vsub.f32 %v1427_v57, %v1396_v48 }
 0x300   : > { %v1452_v21 = vmax.f32 %v1444_v16, 0.0 }
 0x302   : > { %v1468_v61 = vadd.f32 %v1460_v52, %v1452_v21 }
 0x304   : > { %1476 = vst [vmem:[#allocation3 + $0x8] sm:$0xff] %v1468_v61 }
 0x30c   : > { %v1412_v38 = vpop.permute.xlu1 %1411  ;;  %v1402_v14 = vpop.permute.xlu0 %1401 }
 0x30d   : > { %v1441_v24 = vsub.f32 %v1412_v38, %v1393_v34  ;;  %v1439_v60 = vsub.f32 %v1402_v14, %v1391_v5 }
 0x30f   : > { %v1449_v10 = vmax.f32 %v1441_v24, 0.0  ;;  %v1447_v56 = vmax.f32 %v1439_v60, 0.0 }
 0x311   : > { %v1465_v25 = vadd.f32 %v1457_v33, %v1449_v10  ;;  %v1463_v30 = vadd.f32 %v1455_v13, %v1447_v56 }
 0x313   : > { %1473 = vst [vmem:[#allocation3 + $0x10] sm:$0xff] %v1465_v25 }
 0x314   : > { %1471 = vst [vmem:[#allocation3] sm:$0xff] %v1463_v30  ;;  %v1417_v1 = vpop.permute.xlu1 %1416  ;;  %v1407_v35 = vpop.permute.xlu0 %1406 }
 0x315   : > { %v1442_v41 = vsub.f32 %v1417_v1, %v1394_v19  ;;  %v1440_v7 = vsub.f32 %v1407_v35, %v1392_v11 }
 0x317   : > { %v1450_v42 = vmax.f32 %v1442_v41, 0.0  ;;  %v1448_v44 = vmax.f32 %v1440_v7, 0.0 }
 0x319   : > { %v1466_v22 = vadd.f32 %v1458_v50, %v1450_v42  ;;  %v1464_v45 = vadd.f32 %v1456_v59, %v1448_v44 }
 0x31b   : > { %1474 = vst [vmem:[#allocation3 + $0x20] sm:$0xff] %v1466_v22 }
 0x31c   : > { %1472 = vst [vmem:[#allocation3 + $0x18] sm:$0xff] %v1464_v45  ;;  %v1437_v28 = vpop.permute.xlu1 %1436  ;;  %v1432_v20 = vpop.permute.xlu0 %1431 }
 0x31d   : > { %v1446_v47 = vsub.f32 %v1437_v28, %v1398_v4  ;;  %v1445_v2 = vsub.f32 %v1432_v20, %v1397_v55 }
 0x31f   : > { %v1454_v40 = vmax.f32 %v1446_v47, 0.0  ;;  %v1453_v0 = vmax.f32 %v1445_v2, 0.0 }
 0x321   : > { %v1470_v62 = vadd.f32 %v1462_v18, %v1454_v40  ;;  %v1469_v54 = vadd.f32 %v1461_v53, %v1453_v0 }
 0x323   : > { %1478 = vst [vmem:[#allocation3 + $0x38] sm:$0xff] %v1470_v62 }
 0x324   : > { %1477 = vst [vmem:[#allocation3 + $0x30] sm:$0xff] %v1469_v54 }
 0x325 PF: > { %1482 = sbr.rel (!%p1369_p11) target bundleno = 940 (0x3ac), region = 68  ;;  %v1485_v6 = vld [vmem:[#allocation3 + $0x10] sm:$0xff] (%p1369_p11)  ;;  %v1483_v37 = vld [vmem:[#allocation3] sm:$0xff] (%p1369_p11)  ;;  %v1487_v26 = vld [vmem:[#allocation3 + $0x28] sm:$0xff] (%p1369_p11)  ;;  %vm1507_vm1 = vcmask (%p1369_p11), 7168  }
 0x326   : > { %1495 = vadd.xlane.f32.xlu1 (%p1369_p11), %v1485_v6  ;;  %1491 = vadd.xlane.f32.xlu0 (%p1369_p11), %v1483_v37  ;;  %v1486_v36 = vld [vmem:[#allocation3 + $0x20] sm:$0xff] (%p1369_p11)  ;;  %v1484_v8 = vld [vmem:[#allocation3 + $0x18] sm:$0xff] (%p1369_p11)  ;;  %v1488_v29 = vld [vmem:[#allocation3 + $0x8] sm:$0xff] (%p1369_p11) }
 0x327   : > { %1499 = vadd.xlane.f32.xlu2 (%p1369_p11), %v1487_v26 }
 0x32a   : > { %v1490_v9 = vld [vmem:[#allocation3 + $0x38] sm:$0xff] }
 0x32b   : > { %v1489_v58 = vld [vmem:[#allocation3 + $0x30] sm:$0xff] }
 0x32e   : > { %1497 = vadd.xlane.f32.xlu1 %v1486_v36  ;;  %1493 = vadd.xlane.f32.xlu0 %v1484_v8 }
 0x32f   : > { %1501 = vadd.xlane.f32.xlu2 %v1488_v29 }
 0x336   : > { %1505 = vadd.xlane.f32.xlu1 %v1490_v9  ;;  %1503 = vadd.xlane.f32.xlu0 %v1489_v58 }
 0x399   : > { %v1496_v15 = vpop.xlane.xlu1 %1495  ;;  %v1492_v3 = vpop.xlane.xlu0 %1491 }
 0x39a   : > { %1510 = vst.msk [vmem:[%s1879_s17 + $0x10] sm:$0xff] %vm1507_vm1, %v1496_v15  ;;  %v1500_v39 = vpop.xlane.xlu2 %1499 }
 0x39b   : > { %1508 = vst.msk [vmem:[%s1879_s17] sm:$0xff] %vm1507_vm1, %v1492_v3 }
 0x39c   : > { %1512 = vst.msk [vmem:[%s1879_s17 + $0x20] sm:$0xff] %vm1507_vm1, %v1500_v39 }
 0x3a1   : > { %v1498_v23 = vpop.xlane.xlu1 %1497  ;;  %v1494_v31 = vpop.xlane.xlu0 %1493 }
 0x3a2   : > { %1511 = vst.msk [vmem:[%s1879_s17 + $0x18] sm:$0xff] %vm1507_vm1, %v1498_v23  ;;  %v1502_v17 = vpop.xlane.xlu2 %1501 }
 0x3a3   : > { %1509 = vst.msk [vmem:[%s1879_s17 + $0x8] sm:$0xff] %vm1507_vm1, %v1494_v31 }
 0x3a4   : > { %1513 = vst.msk [vmem:[%s1879_s17 + $0x28] sm:$0xff] %vm1507_vm1, %v1502_v17 }
 0x3a9   : > { %v1506_v51 = vpop.xlane.xlu1 %1505  ;;  %v1504_v27 = vpop.xlane.xlu0 %1503 }
 0x3aa   : > { %1515 = vst.msk [vmem:[%s1879_s17 + $0x38] sm:$0xff] %vm1507_vm1, %v1506_v51 }
 0x3ab   : > { %1514 = vst.msk [vmem:[%s1879_s17 + $0x30] sm:$0xff] %vm1507_vm1, %v1504_v27 }
 0x3ac PF: > { %s16_s25 = sadd.s32 1, %s1785_s25   ;;  %s2558_s21 = smov %s1777_s23 }
 0x3ad   : > { %p13_p13 = scmp.ge.s32.totalorder %s16_s25, 6   ;;  %s2559_s22 = smov %s1781_s24 }
 0x3ae   : > { %s2560_s23 = smov %s2563_s26  ;;  %s2561_s24 = smov %s2567_s27 }
 0x3af   :  { %15 = sbr.rel (!%p13_p13) target bundleno = 3 (0x3), region = 109 }

</bundles_post_ra>
